<compile_context>
chip_gen: v7x
topology: tpu7x:2x2x1
jax: 0.10.0
libtpu: 0.0.40
codegen_flags: <defaults>
</compile_context>

<pallas_src>
import functools
import math

import jax
import jax.numpy as jnp
from jax import lax
from jax.experimental import pallas as pl
from jax.experimental.pallas import tpu as pltpu

_PI = math.pi
_INV_PI = 1.0 / math.pi
_EPS = 1e-6


# Deterministic light / view directions.
# TODO(synk): GGXRenderer.generateRendering(1, 9, ...) samples 9 random
# light/view pairs; here a single fixed deterministic pair is used instead.
def _normalize3(v):
    n = math.sqrt(sum(c * c for c in v))
    return tuple(c / n for c in v)


_WI = _normalize3((0.3, 0.2, 1.0))     # light direction
_WO = _normalize3((-0.2, 0.4, 1.0))    # view direction
_H = _normalize3(tuple(a + b for a, b in zip(_WI, _WO)))
_VDOTH = max(sum(a * b for a, b in zip(_WO, _H)), _EPS)
_FRESNEL_K = (1.0 - _VDOTH) ** 5       # compile-time Fresnel Schlick constant
# Fresnel on the raw [-1, 1] specular channel folded into one FMA:
#   f = k + (0.5*s + 0.5) * (1 - k) = _F_A + s * _F_B
_F_A = _FRESNEL_K + 0.5 * (1.0 - _FRESNEL_K)
_F_B = 0.5 * (1.0 - _FRESNEL_K)


def _ggx_shared(nx, ny, nz, rough):
    """Shared per-pixel GGX terms for one material: (D * Vis, ndotl).

    nx, ny, nz : raw [-1, 1] normal-map channels, shape (SUB, 128)
    rough      : scalar roughness in [0.001, 1],   shape (SUB, 128)
    """
    inv_len = lax.rsqrt(nx * nx + ny * ny + nz * nz + _EPS)
    nx = nx * inv_len
    ny = ny * inv_len
    nz = nz * inv_len
    ndoth = jnp.maximum(nx * _H[0] + ny * _H[1] + nz * _H[2], _EPS)
    ndotl = jnp.maximum(nx * _WI[0] + ny * _WI[1] + nz * _WI[2], _EPS)
    ndotv = jnp.maximum(nx * _WO[0] + ny * _WO[1] + nz * _WO[2], _EPS)

    alpha = rough * rough
    alpha2 = alpha * alpha
    denom = ndoth * ndoth * (alpha2 - 1.0) + 1.0
    d_term = alpha2 * pl.reciprocal(_PI * denom * denom, approx=True)
    # Smith G / (4 ndotl ndotv) fused: g1(l) g1(v) / (4 l v) = 1/((l+sl)(v+sv))
    sl = jnp.sqrt(alpha2 + (1.0 - alpha2) * ndotl * ndotl)
    sv = jnp.sqrt(alpha2 + (1.0 - alpha2) * ndotv * ndotv)
    vis = pl.reciprocal((ndotl + sl) * (ndotv + sv), approx=True)
    return d_term * vis, ndotl


def _material_loss_kernel(x_ref, r_ref, abs_ref, rend_ref, acc_abs, acc_rend,
                          *, render):
    # x_ref, r_ref : (12, SUB, 128) channel-major tile (batch dim squeezed)
    # abs_ref      : (12, 128) per-(channel, lane) partial sum of |x - r|
    # rend_ref     : (1, 128)  per-lane partial sum of squared render diff
    # acc_abs      : VMEM (12, SUB, 128) f32 lane-wise |x - r| accumulator
    # acc_rend     : VMEM (SUB, 128)     f32 lane-wise render-diff accumulator
    t = pl.program_id(1)

    @pl.when(t == 0)
    def _():
        acc_abs[...] = jnp.zeros_like(acc_abs)
        if render:
            acc_rend[...] = jnp.zeros_like(acc_rend)

    f32 = lambda a: a.astype(jnp.float32)   # no-op for f32, upcast for bf16

    # --- per-channel L1 reconstruction accumulation (pure VPU, lane-wise) ---
    acc_abs[...] += jnp.abs(f32(x_ref[...]) - f32(r_ref[...]))

    if render:
        # --- rendering branch (optimizer_idx == 0 path of the forward) -----
        # Shared per-pixel terms, once per side.  Roughness: average the three
        # raw channels first, then a single scale + clip.
        rough_x = jnp.clip(
            (f32(x_ref[6]) + f32(x_ref[7]) + f32(x_ref[8])) * (1.0 / 6.0) + 0.5,
            0.001, 1.0)
        dv_x, ndotl_x = _ggx_shared(f32(x_ref[3]), f32(x_ref[4]), f32(x_ref[5]),
                                    rough_x)

        rough_r = jnp.clip(
            (jnp.clip(f32(r_ref[6]), -1.0, 1.0) +
             jnp.clip(f32(r_ref[7]), -1.0, 1.0) +
             jnp.clip(f32(r_ref[8]), -1.0, 1.0)) * (1.0 / 6.0) + 0.5,
            0.001, 1.0)
        dv_r, ndotl_r = _ggx_shared(jnp.clip(f32(r_ref[3]), -1.0, 1.0),
                                    jnp.clip(f32(r_ref[4]), -1.0, 1.0),
                                    jnp.clip(f32(r_ref[5]), -1.0, 1.0),
                                    rough_r)

        # Rendered difference channel-by-channel: only (SUB, 128) temps live,
        # squared diff accumulated immediately (no (3, SUB, 128) intermediates
        # held across the whole render).
        sq = None
        for c in range(3):
            # gamma-corrected linear diffuse albedo; eps clamp keeps a future
            # VJP of x**2.2 finite at 0 (forward change is negligible).
            xd = jnp.power(jnp.maximum(f32(x_ref[c]) * 0.5 + 0.5, _EPS), 2.2)
            rd = jnp.power(
                jnp.maximum(jnp.clip(f32(r_ref[c]), -1.0, 1.0) * 0.5 + 0.5,
                            _EPS),
                2.2)
            # Fresnel Schlick folded to a single FMA on the raw spec channel.
            fx = _F_A + f32(x_ref[9 + c]) * _F_B
            fr = _F_A + jnp.clip(f32(r_ref[9 + c]), -1.0, 1.0) * _F_B
            rx = (xd * _INV_PI + dv_x * fx) * ndotl_x
            rr = (rd * _INV_PI + dv_r * fr) * ndotl_r
            d = rx - rr
            sq = d * d if sq is None else sq + d * d
        acc_rend[...] += sq

    # --- finalize: cross-sublane reductions + tiny lane-dense stores, once
    #     per batch block --------------------------------------------------
    @pl.when(t == pl.num_programs(1) - 1)
    def _():
        for c in range(12):
            abs_ref[c:c + 1, :] = jnp.sum(acc_abs[c], axis=0, keepdims=True)
        if render:
            rend_ref[...] = jnp.sum(acc_rend[...], axis=0, keepdims=True)
        else:
            rend_ref[...] = jnp.zeros_like(rend_ref)


def _choose_tiling(hw, itemsize, sub_cap=512):
    """Pick (SUB rows per tile, T tiles, padded HW, VMEM budget bytes)."""
    n_rows = -(-hw // 128)                 # ceil(HW / 128) lane-rows
    gran = 8 if itemsize == 4 else 16      # sublane granularity (f32 / bf16)

    try:
        vmem_cap = pltpu.get_tpu_info().vmem_capacity_bytes
    except Exception:
        vmem_cap = 64 * 1024 * 1024        # conservative (v7x per-TC)
    budget = min((vmem_cap * 3) // 4, 96 * 1024 * 1024)

    # bytes of VMEM per row of 128 lanes:
    #   2 inputs x 2 pipeline buffers x 12 channels x 128 x itemsize
    # + (12 + 1) f32 accumulator channels x 128 x 4
    per_row = 2 * 2 * 12 * 128 * itemsize + 13 * 128 * 4
    sub_max = (int(budget // per_row) // gran) * gran
    sub_max = max(gran, min(sub_max, sub_cap))

    if n_rows <= sub_max:
        # single tile along the row axis: full-dim block (no x8 requirement)
        return n_rows, 1, n_rows * 128, budget

    # prefer a divisor of n_rows (no padding copy); otherwise pad rows.
    sub = 0
    lower = max(gran, sub_max // 4)
    for cand in range(sub_max, lower - 1, -gran):
        if n_rows % cand == 0:
            sub = cand
            break
    if sub == 0:
        sub = sub_max
    t = -(-n_rows // sub)
    return sub, t, t * sub * 128, budget


def material_loss(codebook_loss, inputs, reconstructions, optimizer_idx,
                  global_step, split="train"):
    """inputs / reconstructions: NCHW (B, 12, H, W), values ~[-1, 1]."""
    B, C, H, W = inputs.shape
    assert C == 12, "MaterialLoss expects 12 channels (4 groups of 3)"
    HW = H * W
    render = (optimizer_idx == 0)          # static Python specialization

    def _prep(a):
        a = jnp.asarray(a)
        if a.dtype != jnp.float32 and a.dtype != jnp.bfloat16:
            a = a.astype(jnp.float32)
        return a.reshape(B, C, HW)         # free contiguous reshape, no copy

    x = _prep(inputs)
    r = _prep(reconstructions)
    if x.dtype != r.dtype:                 # mixed dtypes -> promote both
        x = x.astype(jnp.float32)
        r = r.astype(jnp.float32)

    SUB, T, hw_pad, vmem_budget = _choose_tiling(HW, x.dtype.itemsize)
    if hw_pad != HW:
        # zero padding: |0-0| = 0 and render(0) == render(0), so padded
        # positions contribute nothing to either accumulator.
        pad = ((0, 0), (0, 0), (0, hw_pad - HW))
        x = jnp.pad(x, pad)
        r = jnp.pad(r, pad)
    n_rows = hw_pad // 128
    x = x.reshape(B, C, n_rows, 128)       # (B, 12, N_ROWS, 128), still free
    r = r.reshape(B, C, n_rows, 128)

    kernel = functools.partial(_material_loss_kernel, render=render)
    abs_partial, rend_partial = pl.pallas_call(
        kernel,
        out_shape=(jax.ShapeDtypeStruct((B, C, 128), jnp.float32),
                   jax.ShapeDtypeStruct((B, 1, 128), jnp.float32)),
        grid_spec=pltpu.PrefetchScalarGridSpec(
            num_scalar_prefetch=0,
            grid=(B, T),
            in_specs=[
                pl.BlockSpec((None, C, SUB, 128), lambda b, t: (b, 0, t, 0)),
                pl.BlockSpec((None, C, SUB, 128), lambda b, t: (b, 0, t, 0)),
            ],
            out_specs=(
                pl.BlockSpec((None, C, 128), lambda b, t: (b, 0, 0)),
                pl.BlockSpec((None, 1, 128), lambda b, t: (b, 0, 0)),
            ),
            scratch_shapes=[pltpu.VMEM((C, SUB, 128), jnp.float32),
                            pltpu.VMEM((SUB, 128), jnp.float32)]),
        compiler_params=pltpu.CompilerParams(
            dimension_semantics=("parallel", "arbitrary"),
            vmem_limit_bytes=int(vmem_budget)),
    )(x, r)

    abs_ch = jnp.sum(abs_partial, axis=(0, 2))     # (12,) total |x - r| per ch
    denom_group = B * 3 * HW                       # padded positions sum to 0
    codebook_loss = jnp.asarray(codebook_loss, jnp.float32)

    loss_out = jnp.float32(0.0)
    total_loss = jnp.float32(0.0)
    rec_total = jnp.float32(0.0)
    for g in range(4):
        rec_loss_g = jnp.sum(abs_ch[3 * g:3 * g + 3]) / denom_group
        # TODO(synk): the configured imgloss (LPIPS perceptual + discriminator
        # GAN terms) has no clean Pallas equivalent; per-group loss here is the
        # pixel reconstruction term + codebook term only.
        loss_c = rec_loss_g + codebook_loss
        loss_out = loss_out + loss_c
        total_loss = total_loss + loss_c
        rec_total = rec_total + rec_loss_g

    log_out = {
        f"{split}/total_loss": total_loss,
        f"{split}/quant_loss": 4.0 * codebook_loss,
        f"{split}/rec_loss": rec_total,
    }

    if render:
        rend_loss = jnp.sum(rend_partial) / (B * 3 * HW)
        loss_out = loss_out + rend_loss
        log_out[f"{split}/total_loss"] = log_out[f"{split}/total_loss"] + rend_loss
        log_out[f"{split}/rend_loss"] = rend_loss

    return loss_out, log_out


if __name__ == "__main__":
    key = jax.random.PRNGKey(0)
    k1, k2 = jax.random.split(key, 2)
    B, C, H, W = 2, 12, 16, 16
    inputs = jax.random.uniform(k1, (B, C, H, W), jnp.float32, -1.0, 1.0)
    reconstructions = jax.random.uniform(k2, (B, C, H, W), jnp.float32, -1.2, 1.2)
    codebook_loss = jnp.float32(0.05)

    # generator step (optimizer_idx == 0): L1 + GGX render loss
    loss0, logs0 = material_loss(codebook_loss, inputs, reconstructions,
                                 optimizer_idx=0, global_step=0, split="train")
    jax.block_until_ready(loss0)
    for v in logs0.values():
        jax.block_until_ready(v)

    # discriminator step (optimizer_idx != 0): statically specialized
    # L1-only kernel variant (render branch compiled out).
    loss1, logs1 = material_loss(codebook_loss, inputs, reconstructions,
                                 optimizer_idx=1, global_step=0, split="train")
    jax.block_until_ready(loss1)
    for v in logs1.values():
        jax.block_until_ready(v)

    print("KERNEL_OK")
</pallas_src>

<mosaic_0001>
module attributes {stable_mosaic.version = 11 : i64} {
  func.func @_material_loss_kernel(%arg0: i32, %arg1: i32, %arg2: memref<1x12x2x128xf32, #tpu.memory_space<vmem>>, %arg3: memref<1x12x2x128xf32, #tpu.memory_space<vmem>>, %arg4: memref<1x12x128xf32, #tpu.memory_space<vmem>>, %arg5: memref<1x1x128xf32, #tpu.memory_space<vmem>>, %arg6: memref<12x2x128xf32, #tpu.memory_space<vmem>>, %arg7: memref<2x128xf32, #tpu.memory_space<vmem>>) attributes {dimension_semantics = [#tpu.dimension_semantics<parallel>, #tpu.dimension_semantics<arbitrary>], iteration_bounds = array<i64: 2, 1>, scalar_prefetch = 0 : i64, scratch_operands = 2 : i64, tpu.core_type = #tpu.core_type<tc>, window_params = [{transform_indices = @transform_0, window_bounds = array<i64: 1, 12, 2, 128>}, {transform_indices = @transform_1, window_bounds = array<i64: 1, 12, 2, 128>}, {transform_indices = @transform_2, window_bounds = array<i64: 1, 12, 128>}, {transform_indices = @transform_3, window_bounds = array<i64: 1, 1, 128>}]} {
    %c0_i32 = arith.constant 0 : i32
    %0 = arith.cmpi eq, %arg1, %c0_i32 : i32
    %1 = arith.extui %0 : i1 to i32
    %c0_i32_0 = arith.constant 0 : i32
    %2 = arith.cmpi ne, %1, %c0_i32_0 : i32
    scf.if %2 {
      %cst_214 = arith.constant 0.000000e+00 : f32
      %386 = vector.broadcast %cst_214 : f32 to vector<12x2x128xf32>
      %c0_215 = arith.constant 0 : index
      %c0_216 = arith.constant 0 : index
      %c0_217 = arith.constant 0 : index
      %387 = vector.load %arg6[%c0_215, %c0_216, %c0_217] : memref<12x2x128xf32, #tpu.memory_space<vmem>>, vector<12x2x128xf32>
      tpu.vector_store %arg6[%c0_215, %c0_216, %c0_217], %386 {strides = array<i32>} : memref<12x2x128xf32, #tpu.memory_space<vmem>>, vector<12x2x128xf32>,
      %cst_218 = arith.constant 0.000000e+00 : f32
      %388 = vector.broadcast %cst_218 : f32 to vector<2x128xf32>
      %c0_219 = arith.constant 0 : index
      %c0_220 = arith.constant 0 : index
      %389 = vector.load %arg7[%c0_219, %c0_220] : memref<2x128xf32, #tpu.memory_space<vmem>>, vector<2x128xf32>
      tpu.vector_store %arg7[%c0_219, %c0_220], %388 {strides = array<i32>} : memref<2x128xf32, #tpu.memory_space<vmem>>, vector<2x128xf32>,
    } else {
    }
    %c0 = arith.constant 0 : index
    %c0_1 = arith.constant 0 : index
    %c0_2 = arith.constant 0 : index
    %3 = vector.load %arg6[%c0, %c0_1, %c0_2] : memref<12x2x128xf32, #tpu.memory_space<vmem>>, vector<12x2x128xf32>
    %c0_3 = arith.constant 0 : index
    %c0_4 = arith.constant 0 : index
    %c0_5 = arith.constant 0 : index
    %c0_6 = arith.constant 0 : index
    %4 = vector.load %arg2[%c0_3, %c0_4, %c0_5, %c0_6] : memref<1x12x2x128xf32, #tpu.memory_space<vmem>>, vector<1x12x2x128xf32>
    %5 = vector.shape_cast %4 : vector<1x12x2x128xf32> to vector<12x2x128xf32>
    %c0_7 = arith.constant 0 : index
    %c0_8 = arith.constant 0 : index
    %c0_9 = arith.constant 0 : index
    %c0_10 = arith.constant 0 : index
    %6 = vector.load %arg3[%c0_7, %c0_8, %c0_9, %c0_10] : memref<1x12x2x128xf32, #tpu.memory_space<vmem>>, vector<1x12x2x128xf32>
    %7 = vector.shape_cast %6 : vector<1x12x2x128xf32> to vector<12x2x128xf32>
    %8 = arith.subf %5, %7 : vector<12x2x128xf32>
    %9 = math.absf %8 : vector<12x2x128xf32>
    %10 = arith.addf %3, %9 : vector<12x2x128xf32>
    %c0_11 = arith.constant 0 : index
    %c0_12 = arith.constant 0 : index
    %c0_13 = arith.constant 0 : index
    %11 = vector.load %arg6[%c0_11, %c0_12, %c0_13] : memref<12x2x128xf32, #tpu.memory_space<vmem>>, vector<12x2x128xf32>
    tpu.vector_store %arg6[%c0_11, %c0_12, %c0_13], %10 {strides = array<i32>} : memref<12x2x128xf32, #tpu.memory_space<vmem>>, vector<12x2x128xf32>,
    %c0_14 = arith.constant 0 : index
    %c6 = arith.constant 6 : index
    %c0_15 = arith.constant 0 : index
    %c0_16 = arith.constant 0 : index
    %12 = vector.load %arg2[%c0_14, %c6, %c0_15, %c0_16] : memref<1x12x2x128xf32, #tpu.memory_space<vmem>>, vector<1x1x2x128xf32>
    %13 = vector.shape_cast %12 : vector<1x1x2x128xf32> to vector<2x128xf32>
    %c0_17 = arith.constant 0 : index
    %c7 = arith.constant 7 : index
    %c0_18 = arith.constant 0 : index
    %c0_19 = arith.constant 0 : index
    %14 = vector.load %arg2[%c0_17, %c7, %c0_18, %c0_19] : memref<1x12x2x128xf32, #tpu.memory_space<vmem>>, vector<1x1x2x128xf32>
    %15 = vector.shape_cast %14 : vector<1x1x2x128xf32> to vector<2x128xf32>
    %16 = arith.addf %13, %15 : vector<2x128xf32>
    %c0_20 = arith.constant 0 : index
    %c8 = arith.constant 8 : index
    %c0_21 = arith.constant 0 : index
    %c0_22 = arith.constant 0 : index
    %17 = vector.load %arg2[%c0_20, %c8, %c0_21, %c0_22] : memref<1x12x2x128xf32, #tpu.memory_space<vmem>>, vector<1x1x2x128xf32>
    %18 = vector.shape_cast %17 : vector<1x1x2x128xf32> to vector<2x128xf32>
    %19 = arith.addf %16, %18 : vector<2x128xf32>
    %cst = arith.constant 0.166666672 : f32
    %20 = vector.broadcast %cst : f32 to vector<2x128xf32>
    %21 = arith.mulf %19, %20 : vector<2x128xf32>
    %cst_23 = arith.constant 5.000000e-01 : f32
    %22 = vector.broadcast %cst_23 : f32 to vector<2x128xf32>
    %23 = arith.addf %21, %22 : vector<2x128xf32>
    %cst_24 = arith.constant 1.000000e-03 : f32
    %cst_25 = arith.constant 1.000000e+00 : f32
    %24 = vector.broadcast %cst_24 : f32 to vector<2x128xf32>
    %25 = arith.maximumf %24, %23 : vector<2x128xf32>
    %26 = vector.broadcast %cst_25 : f32 to vector<2x128xf32>
    %27 = arith.minimumf %26, %25 : vector<2x128xf32>
    %c0_26 = arith.constant 0 : index
    %c3 = arith.constant 3 : index
    %c0_27 = arith.constant 0 : index
    %c0_28 = arith.constant 0 : index
    %28 = vector.load %arg2[%c0_26, %c3, %c0_27, %c0_28] : memref<1x12x2x128xf32, #tpu.memory_space<vmem>>, vector<1x1x2x128xf32>
    %29 = vector.shape_cast %28 : vector<1x1x2x128xf32> to vector<2x128xf32>
    %c0_29 = arith.constant 0 : index
    %c4 = arith.constant 4 : index
    %c0_30 = arith.constant 0 : index
    %c0_31 = arith.constant 0 : index
    %30 = vector.load %arg2[%c0_29, %c4, %c0_30, %c0_31] : memref<1x12x2x128xf32, #tpu.memory_space<vmem>>, vector<1x1x2x128xf32>
    %31 = vector.shape_cast %30 : vector<1x1x2x128xf32> to vector<2x128xf32>
    %c0_32 = arith.constant 0 : index
    %c5 = arith.constant 5 : index
    %c0_33 = arith.constant 0 : index
    %c0_34 = arith.constant 0 : index
    %32 = vector.load %arg2[%c0_32, %c5, %c0_33, %c0_34] : memref<1x12x2x128xf32, #tpu.memory_space<vmem>>, vector<1x1x2x128xf32>
    %33 = vector.shape_cast %32 : vector<1x1x2x128xf32> to vector<2x128xf32>
    %34 = arith.mulf %29, %29 : vector<2x128xf32>
    %35 = arith.mulf %31, %31 : vector<2x128xf32>
    %36 = arith.addf %34, %35 : vector<2x128xf32>
    %37 = arith.mulf %33, %33 : vector<2x128xf32>
    %38 = arith.addf %36, %37 : vector<2x128xf32>
    %cst_35 = arith.constant 9.99999997E-7 : f32
    %39 = vector.broadcast %cst_35 : f32 to vector<2x128xf32>
    %40 = arith.addf %38, %39 : vector<2x128xf32>
    %41 = math.rsqrt %40 : vector<2x128xf32>
    %42 = arith.mulf %29, %41 : vector<2x128xf32>
    %43 = arith.mulf %31, %41 : vector<2x128xf32>
    %44 = arith.mulf %33, %41 : vector<2x128xf32>
    %cst_36 = arith.constant 0.0514421649 : f32
    %45 = vector.broadcast %cst_36 : f32 to vector<2x128xf32>
    %46 = arith.mulf %42, %45 : vector<2x128xf32>
    %cst_37 = arith.constant 0.285648078 : f32
    %47 = vector.broadcast %cst_37 : f32 to vector<2x128xf32>
    %48 = arith.mulf %43, %47 : vector<2x128xf32>
    %49 = arith.addf %46, %48 : vector<2x128xf32>
    %cst_38 = arith.constant 0.956952929 : f32
    %50 = vector.broadcast %cst_38 : f32 to vector<2x128xf32>
    %51 = arith.mulf %44, %50 : vector<2x128xf32>
    %52 = arith.addf %49, %51 : vector<2x128xf32>
    %cst_39 = arith.constant 9.99999997E-7 : f32
    %53 = vector.broadcast %cst_39 : f32 to vector<2x128xf32>
    %54 = arith.maximumf %52, %53 : vector<2x128xf32>
    %cst_40 = arith.constant 0.282216251 : f32
    %55 = vector.broadcast %cst_40 : f32 to vector<2x128xf32>
    %56 = arith.mulf %42, %55 : vector<2x128xf32>
    %cst_41 = arith.constant 0.188144177 : f32
    %57 = vector.broadcast %cst_41 : f32 to vector<2x128xf32>
    %58 = arith.mulf %43, %57 : vector<2x128xf32>
    %59 = arith.addf %56, %58 : vector<2x128xf32>
    %cst_42 = arith.constant 0.940720856 : f32
    %60 = vector.broadcast %cst_42 : f32 to vector<2x128xf32>
    %61 = arith.mulf %44, %60 : vector<2x128xf32>
    %62 = arith.addf %59, %61 : vector<2x128xf32>
    %cst_43 = arith.constant 9.99999997E-7 : f32
    %63 = vector.broadcast %cst_43 : f32 to vector<2x128xf32>
    %64 = arith.maximumf %62, %63 : vector<2x128xf32>
    %cst_44 = arith.constant -0.182574183 : f32
    %65 = vector.broadcast %cst_44 : f32 to vector<2x128xf32>
    %66 = arith.mulf %42, %65 : vector<2x128xf32>
    %cst_45 = arith.constant 0.365148365 : f32
    %67 = vector.broadcast %cst_45 : f32 to vector<2x128xf32>
    %68 = arith.mulf %43, %67 : vector<2x128xf32>
    %69 = arith.addf %66, %68 : vector<2x128xf32>
    %cst_46 = arith.constant 0.912870943 : f32
    %70 = vector.broadcast %cst_46 : f32 to vector<2x128xf32>
    %71 = arith.mulf %44, %70 : vector<2x128xf32>
    %72 = arith.addf %69, %71 : vector<2x128xf32>
    %cst_47 = arith.constant 9.99999997E-7 : f32
    %73 = vector.broadcast %cst_47 : f32 to vector<2x128xf32>
    %74 = arith.maximumf %72, %73 : vector<2x128xf32>
    %75 = arith.mulf %27, %27 : vector<2x128xf32>
    %76 = arith.mulf %75, %75 : vector<2x128xf32>
    %77 = arith.mulf %54, %54 : vector<2x128xf32>
    %cst_48 = arith.constant 1.000000e+00 : f32
    %78 = vector.broadcast %cst_48 : f32 to vector<2x128xf32>
    %79 = arith.subf %76, %78 : vector<2x128xf32>
    %80 = arith.mulf %77, %79 : vector<2x128xf32>
    %cst_49 = arith.constant 1.000000e+00 : f32
    %81 = vector.broadcast %cst_49 : f32 to vector<2x128xf32>
    %82 = arith.addf %80, %81 : vector<2x128xf32>
    %cst_50 = arith.constant 3.14159274 : f32
    %83 = vector.broadcast %cst_50 : f32 to vector<2x128xf32>
    %84 = arith.mulf %83, %82 : vector<2x128xf32>
    %85 = arith.mulf %84, %82 : vector<2x128xf32>
    %86 = tpu.reciprocal %85 {approx = true} : vector<2x128xf32> -> vector<2x128xf32>
    %87 = arith.mulf %76, %86 : vector<2x128xf32>
    %cst_51 = arith.constant 1.000000e+00 : f32
    %88 = vector.broadcast %cst_51 : f32 to vector<2x128xf32>
    %89 = arith.subf %88, %76 : vector<2x128xf32>
    %90 = arith.mulf %89, %64 : vector<2x128xf32>
    %91 = arith.mulf %90, %64 : vector<2x128xf32>
    %92 = arith.addf %76, %91 : vector<2x128xf32>
    %93 = math.sqrt %92 : vector<2x128xf32>
    %cst_52 = arith.constant 1.000000e+00 : f32
    %94 = vector.broadcast %cst_52 : f32 to vector<2x128xf32>
    %95 = arith.subf %94, %76 : vector<2x128xf32>
    %96 = arith.mulf %95, %74 : vector<2x128xf32>
    %97 = arith.mulf %96, %74 : vector<2x128xf32>
    %98 = arith.addf %76, %97 : vector<2x128xf32>
    %99 = math.sqrt %98 : vector<2x128xf32>
    %100 = arith.addf %64, %93 : vector<2x128xf32>
    %101 = arith.addf %74, %99 : vector<2x128xf32>
    %102 = arith.mulf %100, %101 : vector<2x128xf32>
    %103 = tpu.reciprocal %102 {approx = true} : vector<2x128xf32> -> vector<2x128xf32>
    %104 = arith.mulf %87, %103 : vector<2x128xf32>
    %c0_53 = arith.constant 0 : index
    %c6_54 = arith.constant 6 : index
    %c0_55 = arith.constant 0 : index
    %c0_56 = arith.constant 0 : index
    %105 = vector.load %arg3[%c0_53, %c6_54, %c0_55, %c0_56] : memref<1x12x2x128xf32, #tpu.memory_space<vmem>>, vector<1x1x2x128xf32>
    %106 = vector.shape_cast %105 : vector<1x1x2x128xf32> to vector<2x128xf32>
    %cst_57 = arith.constant -1.000000e+00 : f32
    %cst_58 = arith.constant 1.000000e+00 : f32
    %107 = vector.broadcast %cst_57 : f32 to vector<2x128xf32>
    %108 = arith.maximumf %107, %106 : vector<2x128xf32>
    %109 = vector.broadcast %cst_58 : f32 to vector<2x128xf32>
    %110 = arith.minimumf %109, %108 : vector<2x128xf32>
    %c0_59 = arith.constant 0 : index
    %c7_60 = arith.constant 7 : index
    %c0_61 = arith.constant 0 : index
    %c0_62 = arith.constant 0 : index
    %111 = vector.load %arg3[%c0_59, %c7_60, %c0_61, %c0_62] : memref<1x12x2x128xf32, #tpu.memory_space<vmem>>, vector<1x1x2x128xf32>
    %112 = vector.shape_cast %111 : vector<1x1x2x128xf32> to vector<2x128xf32>
    %cst_63 = arith.constant -1.000000e+00 : f32
    %cst_64 = arith.constant 1.000000e+00 : f32
    %113 = vector.broadcast %cst_63 : f32 to vector<2x128xf32>
    %114 = arith.maximumf %113, %112 : vector<2x128xf32>
    %115 = vector.broadcast %cst_64 : f32 to vector<2x128xf32>
    %116 = arith.minimumf %115, %114 : vector<2x128xf32>
    %117 = arith.addf %110, %116 : vector<2x128xf32>
    %c0_65 = arith.constant 0 : index
    %c8_66 = arith.constant 8 : index
    %c0_67 = arith.constant 0 : index
    %c0_68 = arith.constant 0 : index
    %118 = vector.load %arg3[%c0_65, %c8_66, %c0_67, %c0_68] : memref<1x12x2x128xf32, #tpu.memory_space<vmem>>, vector<1x1x2x128xf32>
    %119 = vector.shape_cast %118 : vector<1x1x2x128xf32> to vector<2x128xf32>
    %cst_69 = arith.constant -1.000000e+00 : f32
    %cst_70 = arith.constant 1.000000e+00 : f32
    %120 = vector.broadcast %cst_69 : f32 to vector<2x128xf32>
    %121 = arith.maximumf %120, %119 : vector<2x128xf32>
    %122 = vector.broadcast %cst_70 : f32 to vector<2x128xf32>
    %123 = arith.minimumf %122, %121 : vector<2x128xf32>
    %124 = arith.addf %117, %123 : vector<2x128xf32>
    %cst_71 = arith.constant 0.166666672 : f32
    %125 = vector.broadcast %cst_71 : f32 to vector<2x128xf32>
    %126 = arith.mulf %124, %125 : vector<2x128xf32>
    %cst_72 = arith.constant 5.000000e-01 : f32
    %127 = vector.broadcast %cst_72 : f32 to vector<2x128xf32>
    %128 = arith.addf %126, %127 : vector<2x128xf32>
    %cst_73 = arith.constant 1.000000e-03 : f32
    %cst_74 = arith.constant 1.000000e+00 : f32
    %129 = vector.broadcast %cst_73 : f32 to vector<2x128xf32>
    %130 = arith.maximumf %129, %128 : vector<2x128xf32>
    %131 = vector.broadcast %cst_74 : f32 to vector<2x128xf32>
    %132 = arith.minimumf %131, %130 : vector<2x128xf32>
    %c0_75 = arith.constant 0 : index
    %c3_76 = arith.constant 3 : index
    %c0_77 = arith.constant 0 : index
    %c0_78 = arith.constant 0 : index
    %133 = vector.load %arg3[%c0_75, %c3_76, %c0_77, %c0_78] : memref<1x12x2x128xf32, #tpu.memory_space<vmem>>, vector<1x1x2x128xf32>
    %134 = vector.shape_cast %133 : vector<1x1x2x128xf32> to vector<2x128xf32>
    %cst_79 = arith.constant -1.000000e+00 : f32
    %cst_80 = arith.constant 1.000000e+00 : f32
    %135 = vector.broadcast %cst_79 : f32 to vector<2x128xf32>
    %136 = arith.maximumf %135, %134 : vector<2x128xf32>
    %137 = vector.broadcast %cst_80 : f32 to vector<2x128xf32>
    %138 = arith.minimumf %137, %136 : vector<2x128xf32>
    %c0_81 = arith.constant 0 : index
    %c4_82 = arith.constant 4 : index
    %c0_83 = arith.constant 0 : index
    %c0_84 = arith.constant 0 : index
    %139 = vector.load %arg3[%c0_81, %c4_82, %c0_83, %c0_84] : memref<1x12x2x128xf32, #tpu.memory_space<vmem>>, vector<1x1x2x128xf32>
    %140 = vector.shape_cast %139 : vector<1x1x2x128xf32> to vector<2x128xf32>
    %cst_85 = arith.constant -1.000000e+00 : f32
    %cst_86 = arith.constant 1.000000e+00 : f32
    %141 = vector.broadcast %cst_85 : f32 to vector<2x128xf32>
    %142 = arith.maximumf %141, %140 : vector<2x128xf32>
    %143 = vector.broadcast %cst_86 : f32 to vector<2x128xf32>
    %144 = arith.minimumf %143, %142 : vector<2x128xf32>
    %c0_87 = arith.constant 0 : index
    %c5_88 = arith.constant 5 : index
    %c0_89 = arith.constant 0 : index
    %c0_90 = arith.constant 0 : index
    %145 = vector.load %arg3[%c0_87, %c5_88, %c0_89, %c0_90] : memref<1x12x2x128xf32, #tpu.memory_space<vmem>>, vector<1x1x2x128xf32>
    %146 = vector.shape_cast %145 : vector<1x1x2x128xf32> to vector<2x128xf32>
    %cst_91 = arith.constant -1.000000e+00 : f32
    %cst_92 = arith.constant 1.000000e+00 : f32
    %147 = vector.broadcast %cst_91 : f32 to vector<2x128xf32>
    %148 = arith.maximumf %147, %146 : vector<2x128xf32>
    %149 = vector.broadcast %cst_92 : f32 to vector<2x128xf32>
    %150 = arith.minimumf %149, %148 : vector<2x128xf32>
    %151 = arith.mulf %138, %138 : vector<2x128xf32>
    %152 = arith.mulf %144, %144 : vector<2x128xf32>
    %153 = arith.addf %151, %152 : vector<2x128xf32>
    %154 = arith.mulf %150, %150 : vector<2x128xf32>
    %155 = arith.addf %153, %154 : vector<2x128xf32>
    %cst_93 = arith.constant 9.99999997E-7 : f32
    %156 = vector.broadcast %cst_93 : f32 to vector<2x128xf32>
    %157 = arith.addf %155, %156 : vector<2x128xf32>
    %158 = math.rsqrt %157 : vector<2x128xf32>
    %159 = arith.mulf %138, %158 : vector<2x128xf32>
    %160 = arith.mulf %144, %158 : vector<2x128xf32>
    %161 = arith.mulf %150, %158 : vector<2x128xf32>
    %cst_94 = arith.constant 0.0514421649 : f32
    %162 = vector.broadcast %cst_94 : f32 to vector<2x128xf32>
    %163 = arith.mulf %159, %162 : vector<2x128xf32>
    %cst_95 = arith.constant 0.285648078 : f32
    %164 = vector.broadcast %cst_95 : f32 to vector<2x128xf32>
    %165 = arith.mulf %160, %164 : vector<2x128xf32>
    %166 = arith.addf %163, %165 : vector<2x128xf32>
    %cst_96 = arith.constant 0.956952929 : f32
    %167 = vector.broadcast %cst_96 : f32 to vector<2x128xf32>
    %168 = arith.mulf %161, %167 : vector<2x128xf32>
    %169 = arith.addf %166, %168 : vector<2x128xf32>
    %cst_97 = arith.constant 9.99999997E-7 : f32
    %170 = vector.broadcast %cst_97 : f32 to vector<2x128xf32>
    %171 = arith.maximumf %169, %170 : vector<2x128xf32>
    %cst_98 = arith.constant 0.282216251 : f32
    %172 = vector.broadcast %cst_98 : f32 to vector<2x128xf32>
    %173 = arith.mulf %159, %172 : vector<2x128xf32>
    %cst_99 = arith.constant 0.188144177 : f32
    %174 = vector.broadcast %cst_99 : f32 to vector<2x128xf32>
    %175 = arith.mulf %160, %174 : vector<2x128xf32>
    %176 = arith.addf %173, %175 : vector<2x128xf32>
    %cst_100 = arith.constant 0.940720856 : f32
    %177 = vector.broadcast %cst_100 : f32 to vector<2x128xf32>
    %178 = arith.mulf %161, %177 : vector<2x128xf32>
    %179 = arith.addf %176, %178 : vector<2x128xf32>
    %cst_101 = arith.constant 9.99999997E-7 : f32
    %180 = vector.broadcast %cst_101 : f32 to vector<2x128xf32>
    %181 = arith.maximumf %179, %180 : vector<2x128xf32>
    %cst_102 = arith.constant -0.182574183 : f32
    %182 = vector.broadcast %cst_102 : f32 to vector<2x128xf32>
    %183 = arith.mulf %159, %182 : vector<2x128xf32>
    %cst_103 = arith.constant 0.365148365 : f32
    %184 = vector.broadcast %cst_103 : f32 to vector<2x128xf32>
    %185 = arith.mulf %160, %184 : vector<2x128xf32>
    %186 = arith.addf %183, %185 : vector<2x128xf32>
    %cst_104 = arith.constant 0.912870943 : f32
    %187 = vector.broadcast %cst_104 : f32 to vector<2x128xf32>
    %188 = arith.mulf %161, %187 : vector<2x128xf32>
    %189 = arith.addf %186, %188 : vector<2x128xf32>
    %cst_105 = arith.constant 9.99999997E-7 : f32
    %190 = vector.broadcast %cst_105 : f32 to vector<2x128xf32>
    %191 = arith.maximumf %189, %190 : vector<2x128xf32>
    %192 = arith.mulf %132, %132 : vector<2x128xf32>
    %193 = arith.mulf %192, %192 : vector<2x128xf32>
    %194 = arith.mulf %171, %171 : vector<2x128xf32>
    %cst_106 = arith.constant 1.000000e+00 : f32
    %195 = vector.broadcast %cst_106 : f32 to vector<2x128xf32>
    %196 = arith.subf %193, %195 : vector<2x128xf32>
    %197 = arith.mulf %194, %196 : vector<2x128xf32>
    %cst_107 = arith.constant 1.000000e+00 : f32
    %198 = vector.broadcast %cst_107 : f32 to vector<2x128xf32>
    %199 = arith.addf %197, %198 : vector<2x128xf32>
    %cst_108 = arith.constant 3.14159274 : f32
    %200 = vector.broadcast %cst_108 : f32 to vector<2x128xf32>
    %201 = arith.mulf %200, %199 : vector<2x128xf32>
    %202 = arith.mulf %201, %199 : vector<2x128xf32>
    %203 = tpu.reciprocal %202 {approx = true} : vector<2x128xf32> -> vector<2x128xf32>
    %204 = arith.mulf %193, %203 : vector<2x128xf32>
    %cst_109 = arith.constant 1.000000e+00 : f32
    %205 = vector.broadcast %cst_109 : f32 to vector<2x128xf32>
    %206 = arith.subf %205, %193 : vector<2x128xf32>
    %207 = arith.mulf %206, %181 : vector<2x128xf32>
    %208 = arith.mulf %207, %181 : vector<2x128xf32>
    %209 = arith.addf %193, %208 : vector<2x128xf32>
    %210 = math.sqrt %209 : vector<2x128xf32>
    %cst_110 = arith.constant 1.000000e+00 : f32
    %211 = vector.broadcast %cst_110 : f32 to vector<2x128xf32>
    %212 = arith.subf %211, %193 : vector<2x128xf32>
    %213 = arith.mulf %212, %191 : vector<2x128xf32>
    %214 = arith.mulf %213, %191 : vector<2x128xf32>
    %215 = arith.addf %193, %214 : vector<2x128xf32>
    %216 = math.sqrt %215 : vector<2x128xf32>
    %217 = arith.addf %181, %210 : vector<2x128xf32>
    %218 = arith.addf %191, %216 : vector<2x128xf32>
    %219 = arith.mulf %217, %218 : vector<2x128xf32>
    %220 = tpu.reciprocal %219 {approx = true} : vector<2x128xf32> -> vector<2x128xf32>
    %221 = arith.mulf %204, %220 : vector<2x128xf32>
    %c0_111 = arith.constant 0 : index
    %c0_112 = arith.constant 0 : index
    %c0_113 = arith.constant 0 : index
    %c0_114 = arith.constant 0 : index
    %222 = vector.load %arg2[%c0_111, %c0_112, %c0_113, %c0_114] : memref<1x12x2x128xf32, #tpu.memory_space<vmem>>, vector<1x1x2x128xf32>
    %223 = vector.shape_cast %222 : vector<1x1x2x128xf32> to vector<2x128xf32>
    %cst_115 = arith.constant 5.000000e-01 : f32
    %224 = vector.broadcast %cst_115 : f32 to vector<2x128xf32>
    %225 = arith.mulf %223, %224 : vector<2x128xf32>
    %cst_116 = arith.constant 5.000000e-01 : f32
    %226 = vector.broadcast %cst_116 : f32 to vector<2x128xf32>
    %227 = arith.addf %225, %226 : vector<2x128xf32>
    %cst_117 = arith.constant 9.99999997E-7 : f32
    %228 = vector.broadcast %cst_117 : f32 to vector<2x128xf32>
    %229 = arith.maximumf %227, %228 : vector<2x128xf32>
    %cst_118 = arith.constant 2.200000e+00 : f32
    %230 = vector.broadcast %cst_118 : f32 to vector<2x128xf32>
    %231 = math.powf %229, %230 : vector<2x128xf32>
    %c0_119 = arith.constant 0 : index
    %c0_120 = arith.constant 0 : index
    %c0_121 = arith.constant 0 : index
    %c0_122 = arith.constant 0 : index
    %232 = vector.load %arg3[%c0_119, %c0_120, %c0_121, %c0_122] : memref<1x12x2x128xf32, #tpu.memory_space<vmem>>, vector<1x1x2x128xf32>
    %233 = vector.shape_cast %232 : vector<1x1x2x128xf32> to vector<2x128xf32>
    %cst_123 = arith.constant -1.000000e+00 : f32
    %cst_124 = arith.constant 1.000000e+00 : f32
    %234 = vector.broadcast %cst_123 : f32 to vector<2x128xf32>
    %235 = arith.maximumf %234, %233 : vector<2x128xf32>
    %236 = vector.broadcast %cst_124 : f32 to vector<2x128xf32>
    %237 = arith.minimumf %236, %235 : vector<2x128xf32>
    %cst_125 = arith.constant 5.000000e-01 : f32
    %238 = vector.broadcast %cst_125 : f32 to vector<2x128xf32>
    %239 = arith.mulf %237, %238 : vector<2x128xf32>
    %cst_126 = arith.constant 5.000000e-01 : f32
    %240 = vector.broadcast %cst_126 : f32 to vector<2x128xf32>
    %241 = arith.addf %239, %240 : vector<2x128xf32>
    %cst_127 = arith.constant 9.99999997E-7 : f32
    %242 = vector.broadcast %cst_127 : f32 to vector<2x128xf32>
    %243 = arith.maximumf %241, %242 : vector<2x128xf32>
    %cst_128 = arith.constant 2.200000e+00 : f32
    %244 = vector.broadcast %cst_128 : f32 to vector<2x128xf32>
    %245 = math.powf %243, %244 : vector<2x128xf32>
    %c0_129 = arith.constant 0 : index
    %c9 = arith.constant 9 : index
    %c0_130 = arith.constant 0 : index
    %c0_131 = arith.constant 0 : index
    %246 = vector.load %arg2[%c0_129, %c9, %c0_130, %c0_131] : memref<1x12x2x128xf32, #tpu.memory_space<vmem>>, vector<1x1x2x128xf32>
    %247 = vector.shape_cast %246 : vector<1x1x2x128xf32> to vector<2x128xf32>
    %cst_132 = arith.constant 0.49999997 : f32
    %248 = vector.broadcast %cst_132 : f32 to vector<2x128xf32>
    %249 = arith.mulf %247, %248 : vector<2x128xf32>
    %cst_133 = arith.constant 5.000000e-01 : f32
    %250 = vector.broadcast %cst_133 : f32 to vector<2x128xf32>
    %251 = arith.addf %250, %249 : vector<2x128xf32>
    %c0_134 = arith.constant 0 : index
    %c9_135 = arith.constant 9 : index
    %c0_136 = arith.constant 0 : index
    %c0_137 = arith.constant 0 : index
    %252 = vector.load %arg3[%c0_134, %c9_135, %c0_136, %c0_137] : memref<1x12x2x128xf32, #tpu.memory_space<vmem>>, vector<1x1x2x128xf32>
    %253 = vector.shape_cast %252 : vector<1x1x2x128xf32> to vector<2x128xf32>
    %cst_138 = arith.constant -1.000000e+00 : f32
    %cst_139 = arith.constant 1.000000e+00 : f32
    %254 = vector.broadcast %cst_138 : f32 to vector<2x128xf32>
    %255 = arith.maximumf %254, %253 : vector<2x128xf32>
    %256 = vector.broadcast %cst_139 : f32 to vector<2x128xf32>
    %257 = arith.minimumf %256, %255 : vector<2x128xf32>
    %cst_140 = arith.constant 0.49999997 : f32
    %258 = vector.broadcast %cst_140 : f32 to vector<2x128xf32>
    %259 = arith.mulf %257, %258 : vector<2x128xf32>
    %cst_141 = arith.constant 5.000000e-01 : f32
    %260 = vector.broadcast %cst_141 : f32 to vector<2x128xf32>
    %261 = arith.addf %260, %259 : vector<2x128xf32>
    %cst_142 = arith.constant 0.318309873 : f32
    %262 = vector.broadcast %cst_142 : f32 to vector<2x128xf32>
    %263 = arith.mulf %231, %262 : vector<2x128xf32>
    %264 = arith.mulf %104, %251 : vector<2x128xf32>
    %265 = arith.addf %263, %264 : vector<2x128xf32>
    %266 = arith.mulf %265, %64 : vector<2x128xf32>
    %cst_143 = arith.constant 0.318309873 : f32
    %267 = vector.broadcast %cst_143 : f32 to vector<2x128xf32>
    %268 = arith.mulf %245, %267 : vector<2x128xf32>
    %269 = arith.mulf %221, %261 : vector<2x128xf32>
    %270 = arith.addf %268, %269 : vector<2x128xf32>
    %271 = arith.mulf %270, %181 : vector<2x128xf32>
    %272 = arith.subf %266, %271 : vector<2x128xf32>
    %273 = arith.mulf %272, %272 : vector<2x128xf32>
    %c0_144 = arith.constant 0 : index
    %c1 = arith.constant 1 : index
    %c0_145 = arith.constant 0 : index
    %c0_146 = arith.constant 0 : index
    %274 = vector.load %arg2[%c0_144, %c1, %c0_145, %c0_146] : memref<1x12x2x128xf32, #tpu.memory_space<vmem>>, vector<1x1x2x128xf32>
    %275 = vector.shape_cast %274 : vector<1x1x2x128xf32> to vector<2x128xf32>
    %cst_147 = arith.constant 5.000000e-01 : f32
    %276 = vector.broadcast %cst_147 : f32 to vector<2x128xf32>
    %277 = arith.mulf %275, %276 : vector<2x128xf32>
    %cst_148 = arith.constant 5.000000e-01 : f32
    %278 = vector.broadcast %cst_148 : f32 to vector<2x128xf32>
    %279 = arith.addf %277, %278 : vector<2x128xf32>
    %cst_149 = arith.constant 9.99999997E-7 : f32
    %280 = vector.broadcast %cst_149 : f32 to vector<2x128xf32>
    %281 = arith.maximumf %279, %280 : vector<2x128xf32>
    %cst_150 = arith.constant 2.200000e+00 : f32
    %282 = vector.broadcast %cst_150 : f32 to vector<2x128xf32>
    %283 = math.powf %281, %282 : vector<2x128xf32>
    %c0_151 = arith.constant 0 : index
    %c1_152 = arith.constant 1 : index
    %c0_153 = arith.constant 0 : index
    %c0_154 = arith.constant 0 : index
    %284 = vector.load %arg3[%c0_151, %c1_152, %c0_153, %c0_154] : memref<1x12x2x128xf32, #tpu.memory_space<vmem>>, vector<1x1x2x128xf32>
    %285 = vector.shape_cast %284 : vector<1x1x2x128xf32> to vector<2x128xf32>
    %cst_155 = arith.constant -1.000000e+00 : f32
    %cst_156 = arith.constant 1.000000e+00 : f32
    %286 = vector.broadcast %cst_155 : f32 to vector<2x128xf32>
    %287 = arith.maximumf %286, %285 : vector<2x128xf32>
    %288 = vector.broadcast %cst_156 : f32 to vector<2x128xf32>
    %289 = arith.minimumf %288, %287 : vector<2x128xf32>
    %cst_157 = arith.constant 5.000000e-01 : f32
    %290 = vector.broadcast %cst_157 : f32 to vector<2x128xf32>
    %291 = arith.mulf %289, %290 : vector<2x128xf32>
    %cst_158 = arith.constant 5.000000e-01 : f32
    %292 = vector.broadcast %cst_158 : f32 to vector<2x128xf32>
    %293 = arith.addf %291, %292 : vector<2x128xf32>
    %cst_159 = arith.constant 9.99999997E-7 : f32
    %294 = vector.broadcast %cst_159 : f32 to vector<2x128xf32>
    %295 = arith.maximumf %293, %294 : vector<2x128xf32>
    %cst_160 = arith.constant 2.200000e+00 : f32
    %296 = vector.broadcast %cst_160 : f32 to vector<2x128xf32>
    %297 = math.powf %295, %296 : vector<2x128xf32>
    %c0_161 = arith.constant 0 : index
    %c10 = arith.constant 10 : index
    %c0_162 = arith.constant 0 : index
    %c0_163 = arith.constant 0 : index
    %298 = vector.load %arg2[%c0_161, %c10, %c0_162, %c0_163] : memref<1x12x2x128xf32, #tpu.memory_space<vmem>>, vector<1x1x2x128xf32>
    %299 = vector.shape_cast %298 : vector<1x1x2x128xf32> to vector<2x128xf32>
    %cst_164 = arith.constant 0.49999997 : f32
    %300 = vector.broadcast %cst_164 : f32 to vector<2x128xf32>
    %301 = arith.mulf %299, %300 : vector<2x128xf32>
    %cst_165 = arith.constant 5.000000e-01 : f32
    %302 = vector.broadcast %cst_165 : f32 to vector<2x128xf32>
    %303 = arith.addf %302, %301 : vector<2x128xf32>
    %c0_166 = arith.constant 0 : index
    %c10_167 = arith.constant 10 : index
    %c0_168 = arith.constant 0 : index
    %c0_169 = arith.constant 0 : index
    %304 = vector.load %arg3[%c0_166, %c10_167, %c0_168, %c0_169] : memref<1x12x2x128xf32, #tpu.memory_space<vmem>>, vector<1x1x2x128xf32>
    %305 = vector.shape_cast %304 : vector<1x1x2x128xf32> to vector<2x128xf32>
    %cst_170 = arith.constant -1.000000e+00 : f32
    %cst_171 = arith.constant 1.000000e+00 : f32
    %306 = vector.broadcast %cst_170 : f32 to vector<2x128xf32>
    %307 = arith.maximumf %306, %305 : vector<2x128xf32>
    %308 = vector.broadcast %cst_171 : f32 to vector<2x128xf32>
    %309 = arith.minimumf %308, %307 : vector<2x128xf32>
    %cst_172 = arith.constant 0.49999997 : f32
    %310 = vector.broadcast %cst_172 : f32 to vector<2x128xf32>
    %311 = arith.mulf %309, %310 : vector<2x128xf32>
    %cst_173 = arith.constant 5.000000e-01 : f32
    %312 = vector.broadcast %cst_173 : f32 to vector<2x128xf32>
    %313 = arith.addf %312, %311 : vector<2x128xf32>
    %cst_174 = arith.constant 0.318309873 : f32
    %314 = vector.broadcast %cst_174 : f32 to vector<2x128xf32>
    %315 = arith.mulf %283, %314 : vector<2x128xf32>
    %316 = arith.mulf %104, %303 : vector<2x128xf32>
    %317 = arith.addf %315, %316 : vector<2x128xf32>
    %318 = arith.mulf %317, %64 : vector<2x128xf32>
    %cst_175 = arith.constant 0.318309873 : f32
    %319 = vector.broadcast %cst_175 : f32 to vector<2x128xf32>
    %320 = arith.mulf %297, %319 : vector<2x128xf32>
    %321 = arith.mulf %221, %313 : vector<2x128xf32>
    %322 = arith.addf %320, %321 : vector<2x128xf32>
    %323 = arith.mulf %322, %181 : vector<2x128xf32>
    %324 = arith.subf %318, %323 : vector<2x128xf32>
    %325 = arith.mulf %324, %324 : vector<2x128xf32>
    %326 = arith.addf %273, %325 : vector<2x128xf32>
    %c0_176 = arith.constant 0 : index
    %c2 = arith.constant 2 : index
    %c0_177 = arith.constant 0 : index
    %c0_178 = arith.constant 0 : index
    %327 = vector.load %arg2[%c0_176, %c2, %c0_177, %c0_178] : memref<1x12x2x128xf32, #tpu.memory_space<vmem>>, vector<1x1x2x128xf32>
    %328 = vector.shape_cast %327 : vector<1x1x2x128xf32> to vector<2x128xf32>
    %cst_179 = arith.constant 5.000000e-01 : f32
    %329 = vector.broadcast %cst_179 : f32 to vector<2x128xf32>
    %330 = arith.mulf %328, %329 : vector<2x128xf32>
    %cst_180 = arith.constant 5.000000e-01 : f32
    %331 = vector.broadcast %cst_180 : f32 to vector<2x128xf32>
    %332 = arith.addf %330, %331 : vector<2x128xf32>
    %cst_181 = arith.constant 9.99999997E-7 : f32
    %333 = vector.broadcast %cst_181 : f32 to vector<2x128xf32>
    %334 = arith.maximumf %332, %333 : vector<2x128xf32>
    %cst_182 = arith.constant 2.200000e+00 : f32
    %335 = vector.broadcast %cst_182 : f32 to vector<2x128xf32>
    %336 = math.powf %334, %335 : vector<2x128xf32>
    %c0_183 = arith.constant 0 : index
    %c2_184 = arith.constant 2 : index
    %c0_185 = arith.constant 0 : index
    %c0_186 = arith.constant 0 : index
    %337 = vector.load %arg3[%c0_183, %c2_184, %c0_185, %c0_186] : memref<1x12x2x128xf32, #tpu.memory_space<vmem>>, vector<1x1x2x128xf32>
    %338 = vector.shape_cast %337 : vector<1x1x2x128xf32> to vector<2x128xf32>
    %cst_187 = arith.constant -1.000000e+00 : f32
    %cst_188 = arith.constant 1.000000e+00 : f32
    %339 = vector.broadcast %cst_187 : f32 to vector<2x128xf32>
    %340 = arith.maximumf %339, %338 : vector<2x128xf32>
    %341 = vector.broadcast %cst_188 : f32 to vector<2x128xf32>
    %342 = arith.minimumf %341, %340 : vector<2x128xf32>
    %cst_189 = arith.constant 5.000000e-01 : f32
    %343 = vector.broadcast %cst_189 : f32 to vector<2x128xf32>
    %344 = arith.mulf %342, %343 : vector<2x128xf32>
    %cst_190 = arith.constant 5.000000e-01 : f32
    %345 = vector.broadcast %cst_190 : f32 to vector<2x128xf32>
    %346 = arith.addf %344, %345 : vector<2x128xf32>
    %cst_191 = arith.constant 9.99999997E-7 : f32
    %347 = vector.broadcast %cst_191 : f32 to vector<2x128xf32>
    %348 = arith.maximumf %346, %347 : vector<2x128xf32>
    %cst_192 = arith.constant 2.200000e+00 : f32
    %349 = vector.broadcast %cst_192 : f32 to vector<2x128xf32>
    %350 = math.powf %348, %349 : vector<2x128xf32>
    %c0_193 = arith.constant 0 : index
    %c11 = arith.constant 11 : index
    %c0_194 = arith.constant 0 : index
    %c0_195 = arith.constant 0 : index
    %351 = vector.load %arg2[%c0_193, %c11, %c0_194, %c0_195] : memref<1x12x2x128xf32, #tpu.memory_space<vmem>>, vector<1x1x2x128xf32>
    %352 = vector.shape_cast %351 : vector<1x1x2x128xf32> to vector<2x128xf32>
    %cst_196 = arith.constant 0.49999997 : f32
    %353 = vector.broadcast %cst_196 : f32 to vector<2x128xf32>
    %354 = arith.mulf %352, %353 : vector<2x128xf32>
    %cst_197 = arith.constant 5.000000e-01 : f32
    %355 = vector.broadcast %cst_197 : f32 to vector<2x128xf32>
    %356 = arith.addf %355, %354 : vector<2x128xf32>
    %c0_198 = arith.constant 0 : index
    %c11_199 = arith.constant 11 : index
    %c0_200 = arith.constant 0 : index
    %c0_201 = arith.constant 0 : index
    %357 = vector.load %arg3[%c0_198, %c11_199, %c0_200, %c0_201] : memref<1x12x2x128xf32, #tpu.memory_space<vmem>>, vector<1x1x2x128xf32>
    %358 = vector.shape_cast %357 : vector<1x1x2x128xf32> to vector<2x128xf32>
    %cst_202 = arith.constant -1.000000e+00 : f32
    %cst_203 = arith.constant 1.000000e+00 : f32
    %359 = vector.broadcast %cst_202 : f32 to vector<2x128xf32>
    %360 = arith.maximumf %359, %358 : vector<2x128xf32>
    %361 = vector.broadcast %cst_203 : f32 to vector<2x128xf32>
    %362 = arith.minimumf %361, %360 : vector<2x128xf32>
    %cst_204 = arith.constant 0.49999997 : f32
    %363 = vector.broadcast %cst_204 : f32 to vector<2x128xf32>
    %364 = arith.mulf %362, %363 : vector<2x128xf32>
    %cst_205 = arith.constant 5.000000e-01 : f32
    %365 = vector.broadcast %cst_205 : f32 to vector<2x128xf32>
    %366 = arith.addf %365, %364 : vector<2x128xf32>
    %cst_206 = arith.constant 0.318309873 : f32
    %367 = vector.broadcast %cst_206 : f32 to vector<2x128xf32>
    %368 = arith.mulf %336, %367 : vector<2x128xf32>
    %369 = arith.mulf %104, %356 : vector<2x128xf32>
    %370 = arith.addf %368, %369 : vector<2x128xf32>
    %371 = arith.mulf %370, %64 : vector<2x128xf32>
    %cst_207 = arith.constant 0.318309873 : f32
    %372 = vector.broadcast %cst_207 : f32 to vector<2x128xf32>
    %373 = arith.mulf %350, %372 : vector<2x128xf32>
    %374 = arith.mulf %221, %366 : vector<2x128xf32>
    %375 = arith.addf %373, %374 : vector<2x128xf32>
    %376 = arith.mulf %375, %181 : vector<2x128xf32>
    %377 = arith.subf %371, %376 : vector<2x128xf32>
    %378 = arith.mulf %377, %377 : vector<2x128xf32>
    %379 = arith.addf %326, %378 : vector<2x128xf32>
    %c0_208 = arith.constant 0 : index
    %c0_209 = arith.constant 0 : index
    %380 = vector.load %arg7[%c0_208, %c0_209] : memref<2x128xf32, #tpu.memory_space<vmem>>, vector<2x128xf32>
    %381 = arith.addf %380, %379 : vector<2x128xf32>
    %c0_210 = arith.constant 0 : index
    %c0_211 = arith.constant 0 : index
    %382 = vector.load %arg7[%c0_210, %c0_211] : memref<2x128xf32, #tpu.memory_space<vmem>>, vector<2x128xf32>
    tpu.vector_store %arg7[%c0_210, %c0_211], %381 {strides = array<i32>} : memref<2x128xf32, #tpu.memory_space<vmem>>, vector<2x128xf32>,
    %c0_i32_212 = arith.constant 0 : i32
    %383 = arith.cmpi eq, %arg1, %c0_i32_212 : i32
    %384 = arith.extui %383 : i1 to i32
    %c0_i32_213 = arith.constant 0 : i32
    %385 = arith.cmpi ne, %384, %c0_i32_213 : i32
    scf.if %385 {
      %c0_214 = arith.constant 0 : index
      %c0_215 = arith.constant 0 : index
      %c0_216 = arith.constant 0 : index
      %386 = vector.load %arg6[%c0_214, %c0_215, %c0_216] : memref<12x2x128xf32, #tpu.memory_space<vmem>>, vector<1x2x128xf32>
      %387 = vector.shape_cast %386 : vector<1x2x128xf32> to vector<2x128xf32>
      %cst_217 = arith.constant dense<0.000000e+00> : vector<128xf32>
      %388 = vector.multi_reduction <add>, %387, %cst_217 [0] : vector<2x128xf32> to vector<128xf32>
      %389 = vector.shape_cast %388 : vector<128xf32> to vector<1x128xf32>
      %c0_218 = arith.constant 0 : index
      %c0_219 = arith.constant 0 : index
      %c0_220 = arith.constant 0 : index
      %390 = vector.load %arg4[%c0_218, %c0_219, %c0_220] : memref<1x12x128xf32, #tpu.memory_space<vmem>>, vector<1x1x128xf32>
      %391 = vector.shape_cast %390 : vector<1x1x128xf32> to vector<1x128xf32>
      %392 = vector.shape_cast %389 : vector<1x128xf32> to vector<1x1x128xf32>
      tpu.vector_store %arg4[%c0_218, %c0_219, %c0_220], %392 {strides = array<i32>} : memref<1x12x128xf32, #tpu.memory_space<vmem>>, vector<1x1x128xf32>,
      %c1_221 = arith.constant 1 : index
      %c0_222 = arith.constant 0 : index
      %c0_223 = arith.constant 0 : index
      %393 = vector.load %arg6[%c1_221, %c0_222, %c0_223] : memref<12x2x128xf32, #tpu.memory_space<vmem>>, vector<1x2x128xf32>
      %394 = vector.shape_cast %393 : vector<1x2x128xf32> to vector<2x128xf32>
      %cst_224 = arith.constant dense<0.000000e+00> : vector<128xf32>
      %395 = vector.multi_reduction <add>, %394, %cst_224 [0] : vector<2x128xf32> to vector<128xf32>
      %396 = vector.shape_cast %395 : vector<128xf32> to vector<1x128xf32>
      %c0_225 = arith.constant 0 : index
      %c1_226 = arith.constant 1 : index
      %c0_227 = arith.constant 0 : index
      %397 = vector.load %arg4[%c0_225, %c1_226, %c0_227] : memref<1x12x128xf32, #tpu.memory_space<vmem>>, vector<1x1x128xf32>
      %398 = vector.shape_cast %397 : vector<1x1x128xf32> to vector<1x128xf32>
      %399 = vector.shape_cast %396 : vector<1x128xf32> to vector<1x1x128xf32>
      tpu.vector_store %arg4[%c0_225, %c1_226, %c0_227], %399 {strides = array<i32>} : memref<1x12x128xf32, #tpu.memory_space<vmem>>, vector<1x1x128xf32>,
      %c2_228 = arith.constant 2 : index
      %c0_229 = arith.constant 0 : index
      %c0_230 = arith.constant 0 : index
      %400 = vector.load %arg6[%c2_228, %c0_229, %c0_230] : memref<12x2x128xf32, #tpu.memory_space<vmem>>, vector<1x2x128xf32>
      %401 = vector.shape_cast %400 : vector<1x2x128xf32> to vector<2x128xf32>
      %cst_231 = arith.constant dense<0.000000e+00> : vector<128xf32>
      %402 = vector.multi_reduction <add>, %401, %cst_231 [0] : vector<2x128xf32> to vector<128xf32>
      %403 = vector.shape_cast %402 : vector<128xf32> to vector<1x128xf32>
      %c0_232 = arith.constant 0 : index
      %c2_233 = arith.constant 2 : index
      %c0_234 = arith.constant 0 : index
      %404 = vector.load %arg4[%c0_232, %c2_233, %c0_234] : memref<1x12x128xf32, #tpu.memory_space<vmem>>, vector<1x1x128xf32>
      %405 = vector.shape_cast %404 : vector<1x1x128xf32> to vector<1x128xf32>
      %406 = vector.shape_cast %403 : vector<1x128xf32> to vector<1x1x128xf32>
      tpu.vector_store %arg4[%c0_232, %c2_233, %c0_234], %406 {strides = array<i32>} : memref<1x12x128xf32, #tpu.memory_space<vmem>>, vector<1x1x128xf32>,
      %c3_235 = arith.constant 3 : index
      %c0_236 = arith.constant 0 : index
      %c0_237 = arith.constant 0 : index
      %407 = vector.load %arg6[%c3_235, %c0_236, %c0_237] : memref<12x2x128xf32, #tpu.memory_space<vmem>>, vector<1x2x128xf32>
      %408 = vector.shape_cast %407 : vector<1x2x128xf32> to vector<2x128xf32>
      %cst_238 = arith.constant dense<0.000000e+00> : vector<128xf32>
      %409 = vector.multi_reduction <add>, %408, %cst_238 [0] : vector<2x128xf32> to vector<128xf32>
      %410 = vector.shape_cast %409 : vector<128xf32> to vector<1x128xf32>
      %c0_239 = arith.constant 0 : index
      %c3_240 = arith.constant 3 : index
      %c0_241 = arith.constant 0 : index
      %411 = vector.load %arg4[%c0_239, %c3_240, %c0_241] : memref<1x12x128xf32, #tpu.memory_space<vmem>>, vector<1x1x128xf32>
      %412 = vector.shape_cast %411 : vector<1x1x128xf32> to vector<1x128xf32>
      %413 = vector.shape_cast %410 : vector<1x128xf32> to vector<1x1x128xf32>
      tpu.vector_store %arg4[%c0_239, %c3_240, %c0_241], %413 {strides = array<i32>} : memref<1x12x128xf32, #tpu.memory_space<vmem>>, vector<1x1x128xf32>,
      %c4_242 = arith.constant 4 : index
      %c0_243 = arith.constant 0 : index
      %c0_244 = arith.constant 0 : index
      %414 = vector.load %arg6[%c4_242, %c0_243, %c0_244] : memref<12x2x128xf32, #tpu.memory_space<vmem>>, vector<1x2x128xf32>
      %415 = vector.shape_cast %414 : vector<1x2x128xf32> to vector<2x128xf32>
      %cst_245 = arith.constant dense<0.000000e+00> : vector<128xf32>
      %416 = vector.multi_reduction <add>, %415, %cst_245 [0] : vector<2x128xf32> to vector<128xf32>
      %417 = vector.shape_cast %416 : vector<128xf32> to vector<1x128xf32>
      %c0_246 = arith.constant 0 : index
      %c4_247 = arith.constant 4 : index
      %c0_248 = arith.constant 0 : index
      %418 = vector.load %arg4[%c0_246, %c4_247, %c0_248] : memref<1x12x128xf32, #tpu.memory_space<vmem>>, vector<1x1x128xf32>
      %419 = vector.shape_cast %418 : vector<1x1x128xf32> to vector<1x128xf32>
      %420 = vector.shape_cast %417 : vector<1x128xf32> to vector<1x1x128xf32>
      tpu.vector_store %arg4[%c0_246, %c4_247, %c0_248], %420 {strides = array<i32>} : memref<1x12x128xf32, #tpu.memory_space<vmem>>, vector<1x1x128xf32>,
      %c5_249 = arith.constant 5 : index
      %c0_250 = arith.constant 0 : index
      %c0_251 = arith.constant 0 : index
      %421 = vector.load %arg6[%c5_249, %c0_250, %c0_251] : memref<12x2x128xf32, #tpu.memory_space<vmem>>, vector<1x2x128xf32>
      %422 = vector.shape_cast %421 : vector<1x2x128xf32> to vector<2x128xf32>
      %cst_252 = arith.constant dense<0.000000e+00> : vector<128xf32>
      %423 = vector.multi_reduction <add>, %422, %cst_252 [0] : vector<2x128xf32> to vector<128xf32>
      %424 = vector.shape_cast %423 : vector<128xf32> to vector<1x128xf32>
      %c0_253 = arith.constant 0 : index
      %c5_254 = arith.constant 5 : index
      %c0_255 = arith.constant 0 : index
      %425 = vector.load %arg4[%c0_253, %c5_254, %c0_255] : memref<1x12x128xf32, #tpu.memory_space<vmem>>, vector<1x1x128xf32>
      %426 = vector.shape_cast %425 : vector<1x1x128xf32> to vector<1x128xf32>
      %427 = vector.shape_cast %424 : vector<1x128xf32> to vector<1x1x128xf32>
      tpu.vector_store %arg4[%c0_253, %c5_254, %c0_255], %427 {strides = array<i32>} : memref<1x12x128xf32, #tpu.memory_space<vmem>>, vector<1x1x128xf32>,
      %c6_256 = arith.constant 6 : index
      %c0_257 = arith.constant 0 : index
      %c0_258 = arith.constant 0 : index
      %428 = vector.load %arg6[%c6_256, %c0_257, %c0_258] : memref<12x2x128xf32, #tpu.memory_space<vmem>>, vector<1x2x128xf32>
      %429 = vector.shape_cast %428 : vector<1x2x128xf32> to vector<2x128xf32>
      %cst_259 = arith.constant dense<0.000000e+00> : vector<128xf32>
      %430 = vector.multi_reduction <add>, %429, %cst_259 [0] : vector<2x128xf32> to vector<128xf32>
      %431 = vector.shape_cast %430 : vector<128xf32> to vector<1x128xf32>
      %c0_260 = arith.constant 0 : index
      %c6_261 = arith.constant 6 : index
      %c0_262 = arith.constant 0 : index
      %432 = vector.load %arg4[%c0_260, %c6_261, %c0_262] : memref<1x12x128xf32, #tpu.memory_space<vmem>>, vector<1x1x128xf32>
      %433 = vector.shape_cast %432 : vector<1x1x128xf32> to vector<1x128xf32>
      %434 = vector.shape_cast %431 : vector<1x128xf32> to vector<1x1x128xf32>
      tpu.vector_store %arg4[%c0_260, %c6_261, %c0_262], %434 {strides = array<i32>} : memref<1x12x128xf32, #tpu.memory_space<vmem>>, vector<1x1x128xf32>,
      %c7_263 = arith.constant 7 : index
      %c0_264 = arith.constant 0 : index
      %c0_265 = arith.constant 0 : index
      %435 = vector.load %arg6[%c7_263, %c0_264, %c0_265] : memref<12x2x128xf32, #tpu.memory_space<vmem>>, vector<1x2x128xf32>
      %436 = vector.shape_cast %435 : vector<1x2x128xf32> to vector<2x128xf32>
      %cst_266 = arith.constant dense<0.000000e+00> : vector<128xf32>
      %437 = vector.multi_reduction <add>, %436, %cst_266 [0] : vector<2x128xf32> to vector<128xf32>
      %438 = vector.shape_cast %437 : vector<128xf32> to vector<1x128xf32>
      %c0_267 = arith.constant 0 : index
      %c7_268 = arith.constant 7 : index
      %c0_269 = arith.constant 0 : index
      %439 = vector.load %arg4[%c0_267, %c7_268, %c0_269] : memref<1x12x128xf32, #tpu.memory_space<vmem>>, vector<1x1x128xf32>
      %440 = vector.shape_cast %439 : vector<1x1x128xf32> to vector<1x128xf32>
      %441 = vector.shape_cast %438 : vector<1x128xf32> to vector<1x1x128xf32>
      tpu.vector_store %arg4[%c0_267, %c7_268, %c0_269], %441 {strides = array<i32>} : memref<1x12x128xf32, #tpu.memory_space<vmem>>, vector<1x1x128xf32>,
      %c8_270 = arith.constant 8 : index
      %c0_271 = arith.constant 0 : index
      %c0_272 = arith.constant 0 : index
      %442 = vector.load %arg6[%c8_270, %c0_271, %c0_272] : memref<12x2x128xf32, #tpu.memory_space<vmem>>, vector<1x2x128xf32>
      %443 = vector.shape_cast %442 : vector<1x2x128xf32> to vector<2x128xf32>
      %cst_273 = arith.constant dense<0.000000e+00> : vector<128xf32>
      %444 = vector.multi_reduction <add>, %443, %cst_273 [0] : vector<2x128xf32> to vector<128xf32>
      %445 = vector.shape_cast %444 : vector<128xf32> to vector<1x128xf32>
      %c0_274 = arith.constant 0 : index
      %c8_275 = arith.constant 8 : index
      %c0_276 = arith.constant 0 : index
      %446 = vector.load %arg4[%c0_274, %c8_275, %c0_276] : memref<1x12x128xf32, #tpu.memory_space<vmem>>, vector<1x1x128xf32>
      %447 = vector.shape_cast %446 : vector<1x1x128xf32> to vector<1x128xf32>
      %448 = vector.shape_cast %445 : vector<1x128xf32> to vector<1x1x128xf32>
      tpu.vector_store %arg4[%c0_274, %c8_275, %c0_276], %448 {strides = array<i32>} : memref<1x12x128xf32, #tpu.memory_space<vmem>>, vector<1x1x128xf32>,
      %c9_277 = arith.constant 9 : index
      %c0_278 = arith.constant 0 : index
      %c0_279 = arith.constant 0 : index
      %449 = vector.load %arg6[%c9_277, %c0_278, %c0_279] : memref<12x2x128xf32, #tpu.memory_space<vmem>>, vector<1x2x128xf32>
      %450 = vector.shape_cast %449 : vector<1x2x128xf32> to vector<2x128xf32>
      %cst_280 = arith.constant dense<0.000000e+00> : vector<128xf32>
      %451 = vector.multi_reduction <add>, %450, %cst_280 [0] : vector<2x128xf32> to vector<128xf32>
      %452 = vector.shape_cast %451 : vector<128xf32> to vector<1x128xf32>
      %c0_281 = arith.constant 0 : index
      %c9_282 = arith.constant 9 : index
      %c0_283 = arith.constant 0 : index
      %453 = vector.load %arg4[%c0_281, %c9_282, %c0_283] : memref<1x12x128xf32, #tpu.memory_space<vmem>>, vector<1x1x128xf32>
      %454 = vector.shape_cast %453 : vector<1x1x128xf32> to vector<1x128xf32>
      %455 = vector.shape_cast %452 : vector<1x128xf32> to vector<1x1x128xf32>
      tpu.vector_store %arg4[%c0_281, %c9_282, %c0_283], %455 {strides = array<i32>} : memref<1x12x128xf32, #tpu.memory_space<vmem>>, vector<1x1x128xf32>,
      %c10_284 = arith.constant 10 : index
      %c0_285 = arith.constant 0 : index
      %c0_286 = arith.constant 0 : index
      %456 = vector.load %arg6[%c10_284, %c0_285, %c0_286] : memref<12x2x128xf32, #tpu.memory_space<vmem>>, vector<1x2x128xf32>
      %457 = vector.shape_cast %456 : vector<1x2x128xf32> to vector<2x128xf32>
      %cst_287 = arith.constant dense<0.000000e+00> : vector<128xf32>
      %458 = vector.multi_reduction <add>, %457, %cst_287 [0] : vector<2x128xf32> to vector<128xf32>
      %459 = vector.shape_cast %458 : vector<128xf32> to vector<1x128xf32>
      %c0_288 = arith.constant 0 : index
      %c10_289 = arith.constant 10 : index
      %c0_290 = arith.constant 0 : index
      %460 = vector.load %arg4[%c0_288, %c10_289, %c0_290] : memref<1x12x128xf32, #tpu.memory_space<vmem>>, vector<1x1x128xf32>
      %461 = vector.shape_cast %460 : vector<1x1x128xf32> to vector<1x128xf32>
      %462 = vector.shape_cast %459 : vector<1x128xf32> to vector<1x1x128xf32>
      tpu.vector_store %arg4[%c0_288, %c10_289, %c0_290], %462 {strides = array<i32>} : memref<1x12x128xf32, #tpu.memory_space<vmem>>, vector<1x1x128xf32>,
      %c11_291 = arith.constant 11 : index
      %c0_292 = arith.constant 0 : index
      %c0_293 = arith.constant 0 : index
      %463 = vector.load %arg6[%c11_291, %c0_292, %c0_293] : memref<12x2x128xf32, #tpu.memory_space<vmem>>, vector<1x2x128xf32>
      %464 = vector.shape_cast %463 : vector<1x2x128xf32> to vector<2x128xf32>
      %cst_294 = arith.constant dense<0.000000e+00> : vector<128xf32>
      %465 = vector.multi_reduction <add>, %464, %cst_294 [0] : vector<2x128xf32> to vector<128xf32>
      %466 = vector.shape_cast %465 : vector<128xf32> to vector<1x128xf32>
      %c0_295 = arith.constant 0 : index
      %c11_296 = arith.constant 11 : index
      %c0_297 = arith.constant 0 : index
      %467 = vector.load %arg4[%c0_295, %c11_296, %c0_297] : memref<1x12x128xf32, #tpu.memory_space<vmem>>, vector<1x1x128xf32>
      %468 = vector.shape_cast %467 : vector<1x1x128xf32> to vector<1x128xf32>
      %469 = vector.shape_cast %466 : vector<1x128xf32> to vector<1x1x128xf32>
      tpu.vector_store %arg4[%c0_295, %c11_296, %c0_297], %469 {strides = array<i32>} : memref<1x12x128xf32, #tpu.memory_space<vmem>>, vector<1x1x128xf32>,
      %c0_298 = arith.constant 0 : index
      %c0_299 = arith.constant 0 : index
      %470 = vector.load %arg7[%c0_298, %c0_299] : memref<2x128xf32, #tpu.memory_space<vmem>>, vector<2x128xf32>
      %cst_300 = arith.constant dense<0.000000e+00> : vector<128xf32>
      %471 = vector.multi_reduction <add>, %470, %cst_300 [0] : vector<2x128xf32> to vector<128xf32>
      %472 = vector.shape_cast %471 : vector<128xf32> to vector<1x128xf32>
      %c0_301 = arith.constant 0 : index
      %c0_302 = arith.constant 0 : index
      %c0_303 = arith.constant 0 : index
      %473 = vector.load %arg5[%c0_301, %c0_302, %c0_303] : memref<1x1x128xf32, #tpu.memory_space<vmem>>, vector<1x1x128xf32>
      %474 = vector.shape_cast %473 : vector<1x1x128xf32> to vector<1x128xf32>
      %475 = vector.shape_cast %472 : vector<1x128xf32> to vector<1x1x128xf32>
      tpu.vector_store %arg5[%c0_301, %c0_302, %c0_303], %475 {strides = array<i32>} : memref<1x1x128xf32, #tpu.memory_space<vmem>>, vector<1x1x128xf32>,
    } else {
    }
    return
  }
  func.func @transform_0(%arg0: i32, %arg1: i32) -> (i32, i32, i32, i32) {
    %c0_i32 = arith.constant 0 : i32
    %c0_i32_0 = arith.constant 0 : i32
    %c0_i32_1 = arith.constant 0 : i32
    return %arg0, %c0_i32, %arg1, %c0_i32_0 : i32, i32, i32, i32
  }
  func.func @transform_1(%arg0: i32, %arg1: i32) -> (i32, i32, i32, i32) {
    %c0_i32 = arith.constant 0 : i32
    %c0_i32_0 = arith.constant 0 : i32
    %c0_i32_1 = arith.constant 0 : i32
    return %arg0, %c0_i32, %arg1, %c0_i32_0 : i32, i32, i32, i32
  }
  func.func @transform_2(%arg0: i32, %arg1: i32) -> (i32, i32, i32) {
    %c0_i32 = arith.constant 0 : i32
    %c0_i32_0 = arith.constant 0 : i32
    %c0_i32_1 = arith.constant 0 : i32
    return %arg0, %c0_i32, %c0_i32_0 : i32, i32, i32
  }
  func.func @transform_3(%arg0: i32, %arg1: i32) -> (i32, i32, i32) {
    %c0_i32 = arith.constant 0 : i32
    %c0_i32_0 = arith.constant 0 : i32
    %c0_i32_1 = arith.constant 0 : i32
    return %arg0, %c0_i32, %c0_i32_0 : i32, i32, i32
  }
}

</mosaic_0001>

<bundles_post_ra>
// kernel: tpu_custom_call.1
= control target key start
LH: loop header
LB: loop body
LE: loop exit
PB: predicated region body
PF: predicated region fallthrough
CT: control target
= control target key end

     0   :  { %9 = vsyncpa [#allocation5], 0  ;;  %s2047_s0 = inlined_call_operand.hbm [shape: f32[2,12,2,128], index: 0, kind: input, shape index: {}]   ;;  %s2048_s1 = inlined_call_operand.hbm [shape: f32[2,12,2,128], index: 1, kind: input, shape index: {}]   ;;  %s2049_s2 = inlined_call_operand.vmem [shape: f32[2,12,128], index: 2, kind: output, shape index: {0}]   ;;  %s2050_s3 = inlined_call_operand.hbm [shape: f32[2,1,128], index: 3, kind: output, shape index: {1}]  }
   0x1   :  { %11 = vsyncpa [#allocation5 + $0x1], 0 }
   0x2   :  { %12 = vsyncpa [#allocation8], 0 }
   0x3   :  { %14 = vsyncpa [#allocation8 + $0x1], 0 }
   0x4   :  { %15 = vsyncpa [#allocation6], 0 }
   0x5   :  { %17 = vsyncpa [#allocation6 + $0x1], 0  ;;  %s1418_s12 = smov 0   ;;  %s1420_s13 = smov 0  }
   0x6   :  { %s1422_s14 = smov 0   ;;  %s1424_s15 = smov 0  }
   0x7   :  { %s1426_s16 = smov 0   ;;  %s1428_s17 = smov 0  }
   0x8 LB: > { %s920_s18 = sadd.s32 4294967295, %s1390_s17   ;;  %s921_s19 = sadd.s32 4294967294, %s1390_s17   ;;  %s1390_s17 = sphi %s1428_s17, %s23_s17   ;;  %s1386_s16 = sphi %s1426_s16, %s2080_s16   ;;  %s1382_s15 = sphi %s1424_s15, %s2079_s15   ;;  %s1378_s14 = sphi %s1422_s14, %s2078_s14   ;;  %s1374_s13 = sphi %s1420_s13, %s2077_s13   ;;  %s1370_s12 = sphi %s1418_s12, %s2076_s12  }
   0x9   : > { %s35_s20 = sadd.s32 1, %s1386_s16  ;;  %s44_s21 = sadd.s32 1, %s1378_s14 }
   0xa   : > { %p37_p0 = scmp.ge.s32.totalorder %s35_s20, 2  ;;  %p51_p1 = scmp.ne.s32.totalorder %s1378_s14, %s1374_s13 }
   0xb   : > { %p52_p2 = scmp.eq.s32.totalorder %s1390_s17, 0  ;;  %p57_p3 = scmp.ne.s32.totalorder %s1374_s13, %s1370_s12 }
   0xc   : > { %s2082_s20 = smov (%p37_p0, %s35_s20), 0  ;;  %p58_p5 = scmp.eq.s32.totalorder %s920_s18, 0 }
   0xd   : > { %p1459_p4 = por %p52_p2, %p51_p1  ;;  %s39_s23 = ssub.s32 %s1386_s16, %s2082_s20 }
   0xe   : > { %p135_p6 = scmp.eq.s32.totalorder %s920_s18, 1  ;;  %p42_p7 = scmp.eq.s32.totalorder %s39_s23, 0 }
   0xf   : > { %p1465_p8 = por %p58_p5, %p57_p3  ;;  %p141_p10 = scmp.eq.s32.totalorder %s921_s19, 1 }
  0x10   : > { %p1469_p9 = por %p135_p6, %p51_p1  ;;  %p1147_p13 = scmp.lt.s32.totalorder %s1390_s17, 2 }
  0x11   : > { %s2054_s24 = scalar_select %p1465_p8, 1, 0 }
  0x12   : > { %s2055_s25 = scalar_select %p1469_p9, 1, 0 }
  0x13   : > { %s1474_s26 = scalar_select %p42_p7, %s1378_s14, %s44_s21  }
  0x14   : > { %p1476_p11 = por %p141_p10, %p57_p3  ;;  %s1483_s28 = sand.u32 1, %s1378_s14  }
  0x15   : > { %s969_s29 = smul.u32 24, %s1483_s28  ;;  %p1489_p0 = pnand %p1147_p13, %p1459_p4 }
  0x16   : > { %s2056_s27 = scalar_select %p1476_p11, 1, 0 }
  0x17   : > { %s970_s30 = smul.u32 384, %s1386_s16  ;;  %s165_s8 = scalar_lea.vmem [#allocation4], %s969_s29 }
  0x18   : > { %s173_s9 = sshll.u32 %s165_s8, 4  ;;  %s162_s10 = scalar_lea.sflag [#allocation5], %s1483_s28  ;;  %s1502_s9 = int_to_ptr.vmem [resolvable:$true] %s173_s9 }
  0x19   : > { %s1498_s7 = scalar_lea.hbm %s2047_s0, %s970_s30  ;;  %p1246_p3 = pneg %p1489_p0 }
  0x1a   : > { %s1244_s11 = scalar_lea.hbm %s1498_s7, 384  ;;  %s1249_s21 = scalar_lea.hbm %s2047_s0, 768 }
  0x1b   : > { %p1245_p2 = scmp.ne.s32.totalorder %s1498_s7, %s1244_s11  ;;  %p1250_p6 = scmp.lt.u32.totalorder %s1498_s7, %s2047_s0 }
  0x1c   : > { %p1251_p7 = scmp.lt.u32.totalorder %s1249_s21, %s1244_s11  ;;  %p1253_p13 = scmp.lt.u32.totalorder %s1244_s11, %s1498_s7 }
  0x1d   : > { %p1247_p4 = pnand %p1246_p3, %p1245_p2 }
  0x1e   : > { %p1252_p10 = por %p1251_p7, %p1250_p6 }
  0x1f   : > { %p1248_p5 = pneg %p1247_p4 }
  0x20   : > { %p1254_p12 = por %p1253_p13, %p1252_p10 }
  0x22   : > { %p1255_p1 = pnand %p1254_p12, %p1248_p5 }
  0x24   : > { %1258 = shalt.err (!%p1255_p1)
}
  0x25   : > { %s1259_s5 = scalar_lea.vmem %s1502_s9, 384  ;;  %s1392_s6 = smov [#allocation4]  }
  0x26   : > { %p1260_p2 = scmp.ne.s32.totalorder %s1502_s9, %s1259_s5  ;;  %s1264_s8 = sshll.u32 %s1392_s6, 4  ;;  %s1265_s8 = int_to_ptr.vmem [resolvable:$false] %s1264_s8 }
  0x27   : > { %s1266_s18 = scalar_lea.vmem %s1265_s8, 768  ;;  %p1267_p9 = scmp.lt.s32.totalorder %s1502_s9, %s1265_s8 }
  0x28   : > { %p1262_p4 = pnand %p1260_p2, %p1246_p3  ;;  %p1268_p6 = scmp.lt.s32.totalorder %s1266_s18, %s1259_s5 }
  0x2a   : > { %p1263_p11 = pneg %p1262_p4  ;;  %p1269_p7 = por %p1268_p6, %p1267_p9 }
  0x2c   : > { %p1270_p10 = pnand %p1269_p7, %p1263_p11 }
  0x2e   : > { %1273 = shalt.err (!%p1270_p10)
}
  0x2f   : > { %s1393_s11 = smov 32   ;;  %s1394_s19 = smov 2  }
  0x30   : > { %1139 = dma.hbm_to_vmem [thread:$0]  (!%p1489_p0), %s1498_s7, 384, %s1502_s9, %s162_s10, %s1393_s11, %s1393_s11, %s1394_s19  }
  0x31   : > { %p203_p9 = scmp.lt.s32.totalorder %s1390_s17, 3  ;;  %s1542_s23 = scalar_lea.hbm %s2048_s1, %s970_s30 }
  0x32   : > { %p2058_p11 = scmp.ge.s32.totalorder %s1390_s17, 1  ;;  %s187_s6 = scalar_lea.vmem [#allocation7], %s969_s29 }
  0x33   : > { %s195_s8 = sshll.u32 %s187_s6, 4  ;;  %s184_s7 = scalar_lea.sflag [#allocation8], %s1483_s28  ;;  %s1552_s8 = int_to_ptr.vmem [resolvable:$true] %s195_s8 }
  0x34   : > { %p1546_p12 = pnand %p2058_p11, %p203_p9  ;;  %s1274_s9 = scalar_lea.hbm %s1542_s23, 384 }
  0x35   : > { %p1275_p1 = scmp.ne.s32.totalorder %s1542_s23, %s1274_s9  ;;  %s1279_s18 = scalar_lea.hbm %s2048_s1, 768 }
  0x36   : > { %p1280_p2 = scmp.lt.u32.totalorder %s1542_s23, %s2048_s1  ;;  %p1281_p4 = scmp.lt.u32.totalorder %s1279_s18, %s1274_s9 }
  0x37   : > { %p1277_p5 = pnand %p1275_p1, %p1246_p3  ;;  %p1283_p7 = scmp.lt.u32.totalorder %s1274_s9, %s1542_s23 }
  0x38   : > { %p1282_p6 = por %p1281_p4, %p1280_p2 }
  0x39   : > { %p1278_p13 = pneg %p1277_p5 }
  0x3a   : > { %p1284_p10 = por %p1283_p7, %p1282_p6 }
  0x3c   : > { %p1285_p9 = pnand %p1284_p10, %p1278_p13 }
  0x3e   : > { %1288 = shalt.err (!%p1285_p9)
}
  0x3f   : > { %s1289_s29 = scalar_lea.vmem %s1552_s8, 384  ;;  %s1395_s6 = smov [#allocation7]  }
  0x40   : > { %p1290_p11 = scmp.ne.s32.totalorder %s1552_s8, %s1289_s29  ;;  %s1294_s30 = sshll.u32 %s1395_s6, 4  ;;  %s1295_s30 = int_to_ptr.vmem [resolvable:$false] %s1294_s30 }
  0x41   : > { %s1296_s10 = scalar_lea.vmem %s1295_s30, 768  ;;  %p1297_p8 = scmp.lt.s32.totalorder %s1552_s8, %s1295_s30 }
  0x42   : > { %p1292_p1 = pnand %p1290_p11, %p1246_p3  ;;  %p1298_p2 = scmp.lt.s32.totalorder %s1296_s10, %s1289_s29 }
  0x44   : > { %p1293_p5 = pneg %p1292_p1  ;;  %p1299_p4 = por %p1298_p2, %p1297_p8 }
  0x46   : > { %p1300_p6 = pnand %p1299_p4, %p1293_p5 }
  0x48   : > { %1303 = shalt.err (!%p1300_p6)
}
  0x49   : > { %1142 = dma.hbm_to_vmem [thread:$0]  (!%p1489_p0), %s1542_s23, 384, %s1552_s8, %s184_s7, %s1393_s11, %s1393_s11, %s1394_s19  }
  0x4a   : > { %207 = sbr.rel (%p1546_p12) target bundleno = 255 (0xff), region = 28  ;;  %s1586_s9 = sand.u32 (!%p1546_p12), 1, %s1374_s13  }
  0x4b   : > { %s973_s18 = smul.u32 (!%p1546_p12), 24, %s1586_s9  ;;  %s210_s21 = scalar_lea.sflag (!%p1546_p12), [#allocation5], %s1586_s9 }
  0x4c   : > { %p2060_p8 = scmp.ne.s32.totalorder (!%p1546_p12), %s2054_s24, 0 }
  0x4d   : > { %s1590_s4 = scalar_lea.vmem (!%p1546_p12), [#allocation4], %s973_s18 }
  0x51   : > { %1357 = dma.done.wait (%p2060_p8), %s210_s21, 384  }
  0x52   : > { %1359 = vsyncadd (%p2060_p8), %s210_s21, 4294966912  ;;  %s219_s28 = scalar_lea.sflag [#allocation8], %s1586_s9  ;;  %s1597_s11 = scalar_lea.vmem [#allocation7], %s973_s18 }
  0x53   : > { %1361 = dma.done.wait (%p2060_p8), %s219_s28, 384  }
  0x54   : > { %1363 = vsyncadd (%p2060_p8), %s219_s28, 4294966912  ;;  %v1396_v0 = vmov 0.0   ;;  %v288_v1 = vld [vmem:[%s1590_s4] sm:$0x3]  ;;  %v300_v2 = vld [vmem:[%s1597_s11] sm:$0x3] }
  0x55   : > { %263 = vst [vmem:[#allocation2] sm:$0x3] %v1396_v0  ;;  %264 = vst [vmem:[#allocation2 + $0x2] sm:$0x3] %v1396_v0  ;;  %v289_v3 = vld [vmem:[%s1590_s4 + $0x2] sm:$0x3]  ;;  %v312_v5 = vsub.f32 %v288_v1, %v300_v2 }
  0x56   : > { %265 = vst [vmem:[#allocation2 + $0x4] sm:$0x3] %v1396_v0  ;;  %266 = vst [vmem:[#allocation2 + $0x6] sm:$0x3] %v1396_v0  ;;  %v301_v6 = vld [vmem:[%s1597_s11 + $0x2] sm:$0x3] }
  0x57   : > { %267 = vst [vmem:[#allocation2 + $0x8] sm:$0x3] %v1396_v0  ;;  %268 = vst [vmem:[#allocation2 + $0xa] sm:$0x3] %v1396_v0  ;;  %v313_v8 = vsub.f32 %v289_v3, %v301_v6  ;;  %v290_v9 = vld [vmem:[%s1590_s4 + $0x4] sm:$0x3] }
  0x58   : > { %269 = vst [vmem:[#allocation2 + $0xc] sm:$0x3] %v1396_v0  ;;  %270 = vst [vmem:[#allocation2 + $0xe] sm:$0x3] %v1396_v0  ;;  %v302_v10 = vld [vmem:[%s1597_s11 + $0x4] sm:$0x3] }
  0x59   : > { %271 = vst [vmem:[#allocation2 + $0x10] sm:$0x3] %v1396_v0  ;;  %272 = vst [vmem:[#allocation2 + $0x12] sm:$0x3] %v1396_v0  ;;  %v324_v11 = vand.u32 2147483647, %v312_v5  ;;  %v314_v13 = vsub.f32 %v290_v9, %v302_v10 }
  0x5a   : > { %273 = vst [vmem:[#allocation2 + $0x14] sm:$0x3] %v1396_v0  ;;  %274 = vst [vmem:[#allocation2 + $0x16] sm:$0x3] %v1396_v0  ;;  %v291_v14 = vld [vmem:[%s1590_s4 + $0x6] sm:$0x3] }
  0x5b   : > { %275 = vst [vmem:[#allocation3] sm:$0x3] %v1396_v0  ;;  %v325_v15 = vand.u32 2147483647, %v313_v8  ;;  %v303_v17 = vld [vmem:[%s1597_s11 + $0x6] sm:$0x3] }
  0x5c   : > { %v276_v4 = vld [vmem:[#allocation2] sm:$0x3]  ;;  %v277_v7 = vld [vmem:[#allocation2 + $0x2] sm:$0x3]  ;;  %v326_v19 = vand.u32 2147483647, %v314_v13  ;;  %v315_v20 = vsub.f32 %v291_v14, %v303_v17 }
  0x5d   : > { %v278_v12 = vld [vmem:[#allocation2 + $0x4] sm:$0x3]  ;;  %v279_v16 = vld [vmem:[#allocation2 + $0x6] sm:$0x3]  ;;  %v336_v18 = vadd.f32 %v324_v11, %v276_v4  ;;  %v292_v21 = vld [vmem:[%s1590_s4 + $0x8] sm:$0x3]  ;;  %v337_v23 = vadd.f32 %v325_v15, %v277_v7 }
  0x5e   : > { %v304_v22 = vld [vmem:[%s1597_s11 + $0x8] sm:$0x3]  ;;  %v280_v24 = vld [vmem:[#allocation2 + $0x8] sm:$0x3]  ;;  %v293_v26 = vld [vmem:[%s1590_s4 + $0xa] sm:$0x3]  ;;  %v338_v28 = vadd.f32 %v326_v19, %v278_v12 }
  0x5f   : > { %v316_v25 = vsub.f32 %v292_v21, %v304_v22  ;;  %v305_v27 = vld [vmem:[%s1597_s11 + $0xa] sm:$0x3]  ;;  %348 = vst [vmem:[#allocation2] sm:$0x3] %v336_v18  ;;  %v327_v29 = vand.u32 2147483647, %v315_v20 }
  0x60   : > { %v281_v30 = vld [vmem:[#allocation2 + $0xa] sm:$0x3]  ;;  %v317_v31 = vsub.f32 %v293_v26, %v305_v27  ;;  %v294_v32 = vld [vmem:[%s1590_s4 + $0xc] sm:$0x3]  ;;  %349 = vst [vmem:[#allocation2 + $0x2] sm:$0x3] %v337_v23 }
  0x61   : > { %v328_v33 = vand.u32 2147483647, %v316_v25  ;;  %v282_v34 = vld [vmem:[#allocation2 + $0xc] sm:$0x3]  ;;  %v306_v35 = vld [vmem:[%s1597_s11 + $0xc] sm:$0x3]  ;;  %v339_v36 = vadd.f32 %v327_v29, %v279_v16 }
  0x62   : > { %350 = vst [vmem:[#allocation2 + $0x4] sm:$0x3] %v338_v28  ;;  %v329_v37 = vand.u32 2147483647, %v317_v31  ;;  %v318_v38 = vsub.f32 %v294_v32, %v306_v35  ;;  %v295_v39 = vld [vmem:[%s1590_s4 + $0xe] sm:$0x3] }
  0x63   : > { %v307_v40 = vld [vmem:[%s1597_s11 + $0xe] sm:$0x3]  ;;  %v340_v41 = vadd.f32 %v328_v33, %v280_v24  ;;  %v283_v42 = vld [vmem:[#allocation2 + $0xe] sm:$0x3]  ;;  %v296_v44 = vld [vmem:[%s1590_s4 + $0x10] sm:$0x3] }
  0x64   : > { %v319_v43 = vsub.f32 %v295_v39, %v307_v40  ;;  %v308_v45 = vld [vmem:[%s1597_s11 + $0x10] sm:$0x3]  ;;  %351 = vst [vmem:[#allocation2 + $0x6] sm:$0x3] %v339_v36  ;;  %v341_v46 = vadd.f32 %v329_v37, %v281_v30  ;;  %v330_v47 = vand.u32 2147483647, %v318_v38 }
  0x65   : > { %v284_v48 = vld [vmem:[#allocation2 + $0x10] sm:$0x3]  ;;  %v320_v49 = vsub.f32 %v296_v44, %v308_v45  ;;  %v297_v50 = vld [vmem:[%s1590_s4 + $0x12] sm:$0x3]  ;;  %352 = vst [vmem:[#allocation2 + $0x8] sm:$0x3] %v340_v41 }
  0x66   : > { %v331_v51 = vand.u32 2147483647, %v319_v43  ;;  %v285_v52 = vld [vmem:[#allocation2 + $0x12] sm:$0x3]  ;;  %v309_v53 = vld [vmem:[%s1597_s11 + $0x12] sm:$0x3]  ;;  %v342_v54 = vadd.f32 %v330_v47, %v282_v34 }
  0x67   : > { %353 = vst [vmem:[#allocation2 + $0xa] sm:$0x3] %v341_v46  ;;  %v332_v55 = vand.u32 2147483647, %v320_v49  ;;  %v321_v56 = vsub.f32 %v297_v50, %v309_v53  ;;  %v286_v57 = vld [vmem:[#allocation2 + $0x14] sm:$0x3] }
  0x68   : > { %v298_v58 = vld [vmem:[%s1590_s4 + $0x14] sm:$0x3]  ;;  %v310_v59 = vld [vmem:[%s1597_s11 + $0x14] sm:$0x3]  ;;  %v343_v60 = vadd.f32 %v331_v51, %v283_v42  ;;  %v299_v63 = vld [vmem:[%s1590_s4 + $0x16] sm:$0x3] }
  0x69   : > { %v322_v61 = vsub.f32 %v298_v58, %v310_v59  ;;  %v287_v62 = vld [vmem:[#allocation2 + $0x16] sm:$0x3]  ;;  %v311_v0 = vld [vmem:[%s1597_s11 + $0x16] sm:$0x3]  ;;  %354 = vst [vmem:[#allocation2 + $0xc] sm:$0x3] %v342_v54  ;;  %v344_v1 = vadd.f32 %v332_v55, %v284_v48 }
  0x6a   : > { %v333_v2 = vand.u32 2147483647, %v321_v56  ;;  %v323_v3 = vsub.f32 %v299_v63, %v311_v0  ;;  %v929_v4 = vld [vmem:[%s1590_s4 + $0xc] sm:$0x3]  ;;  %v930_v5 = vld [vmem:[%s1590_s4 + $0xe] sm:$0x3] }
  0x6b   : > { %355 = vst [vmem:[#allocation2 + $0xe] sm:$0x3] %v343_v60  ;;  %v334_v6 = vand.u32 2147483647, %v322_v61  ;;  %v364_v7 = vadd.f32 %v930_v5, %v929_v4  ;;  %v931_v8 = vld [vmem:[%s1590_s4 + $0x10] sm:$0x3] }
  0x6c   : > { %v1631_v9 = vld [vmem:[%s1590_s4 + $0x6] sm:$0x3]  ;;  %356 = vst [vmem:[#allocation2 + $0x10] sm:$0x3] %v344_v1  ;;  %v345_v10 = vadd.f32 %v333_v2, %v285_v52  ;;  %v335_v11 = vand.u32 2147483647, %v323_v3 }
  0x6d   : > { %v1634_v12 = vld [vmem:[%s1590_s4 + $0x8] sm:$0x3]  ;;  %v1637_v13 = vld [vmem:[%s1590_s4 + $0xa] sm:$0x3]  ;;  %v378_v14 = vmul.f32 %v1631_v9, %v1631_v9  ;;  %v346_v15 = vadd.f32 %v334_v6, %v286_v57  ;;  %v367_v16 = vadd.f32 %v931_v8, %v364_v7  ;;  %v936_v19 = vld [vmem:[%s1597_s11 + $0xc] sm:$0x3] }
  0x6e   : > { %v379_v17 = vmul.f32 %v1634_v12, %v1634_v12  ;;  %v381_v18 = vmul.f32 %v1637_v13, %v1637_v13  ;;  %v938_v20 = vld [vmem:[%s1597_s11 + $0xe] sm:$0x3]  ;;  %v940_v21 = vld [vmem:[%s1597_s11 + $0x10] sm:$0x3]  ;;  %357 = vst [vmem:[#allocation2 + $0x12] sm:$0x3] %v345_v10  ;;  %v347_v22 = vadd.f32 %v335_v11, %v287_v62 }
  0x6f   : > { %v937_v23 = vclamps-f32 %v936_v19, 1.0  ;;  %v939_v24 = vclamps-f32 %v938_v20, 1.0  ;;  %v941_v25 = vclamps-f32 %v940_v21, 1.0  ;;  %v942_v26 = vld [vmem:[%s1597_s11 + $0x6] sm:$0x3]  ;;  %p254_p0 = scmp.lt.s32.totalorder %s1382_s15, 1 }
  0x70   : > { %358 = vst [vmem:[#allocation2 + $0x14] sm:$0x3] %v346_v15  ;;  %v368_v27 = vmul.f32 0.16666667, %v367_v16  ;;  %v380_v28 = vadd.f32 %v379_v17, %v378_v14  ;;  %v1649_v29 = vclamps-f32 %v942_v26, 1.0  ;;  %s253_s7 = scalar_lea.vmem [#allocation9], %s1586_s9 }
  0x71   : > { %v944_v30 = vld [vmem:[%s1597_s11 + $0x8] sm:$0x3]  ;;  %359 = vst [vmem:[#allocation2 + $0x16] sm:$0x3] %v347_v22  ;;  %v450_v31 = vadd.f32 %v939_v24, %v937_v23  ;;  %v946_v33 = vld [vmem:[%s1597_s11 + $0xa] sm:$0x3] }
  0x72   : > { %v1652_v32 = vclamps-f32 %v944_v30, 1.0  ;;  %v536_v34 = vld [vmem:[%s1590_s4] sm:$0x3]  ;;  %v369_v35 = vadd.f32 0.5, %v368_v27  ;;  %v382_v36 = vadd.f32 %v381_v18, %v380_v28  ;;  %v1656_v37 = vclamps-f32 %v946_v33, 1.0  ;;  %s1879_s24 = scalar_select %p254_p0, %s1382_s15, 1 }
  0x73   : > { %v472_v38 = vmul.f32 %v1649_v29, %v1649_v29  ;;  %v541_v39 = vld [vmem:[%s1597_s11] sm:$0x3]  ;;  %v455_v40 = vadd.f32 %v941_v25, %v450_v31  ;;  %v537_v42 = vmul.f32 0.5, %v536_v34  ;;  %v953_v56 = vld [vmem:[%s1590_s4 + $0x2] sm:$0x3]  ;;  %s794_s22 = sshll.u32 %s253_s7, 4  ;;  %s1995_s22 = int_to_ptr.vmem [resolvable:$true] %s794_s22 }
  0x74   : > { %v473_v41 = vmul.f32 %v1652_v32, %v1652_v32  ;;  %v949_v43 = vclamps-f32 %v541_v39, 1.0  ;;  %v370_v44 = vmax.f32 %v369_v35, 0.001  ;;  %v383_v45 = vadd.f32 1e-06, %v382_v36  ;;  %s968_s19 = sshll.u32 %s1879_s24, 4 }
  0x75   : > { %v475_v46 = vmul.f32 %v1656_v37, %v1656_v37  ;;  %v456_v47 = vmul.f32 0.16666667, %v455_v40  ;;  %v538_v49 = vadd.f32 0.5, %v537_v42  ;;  %v570_v61 = vmul.f32 0.5, %v953_v56  ;;  %v954_v0 = vld [vmem:[%s1597_s11 + $0x2] sm:$0x3]  ;;  %s1902_s8 = scalar_lea.vmem %s2049_s2, %s968_s19 }
  0x76   : > { %v474_v48 = vadd.f32 %v473_v41, %v472_v38  ;;  %v544_v50 = vmul.f32 0.5, %v949_v43  ;;  %v371_v51 = vmin.f32 %v370_v44, 1.0  ;;  %1200 = vrsqrt.f32 %v383_v45  ;;  %v950_v2 = vld [vmem:[%s1590_s4 + $0x12] sm:$0x3]  ;;  %v951_v56 = vld [vmem:[%s1597_s11 + $0x12] sm:$0x3] }
  0x77   : > { %v457_v52 = vadd.f32 0.5, %v456_v47  ;;  %v1665_v54 = vmax.f32 %v538_v49, 1e-06  ;;  %v571_v4 = vadd.f32 0.5, %v570_v61  ;;  %v955_v5 = vclamps-f32 %v954_v0, 1.0  ;;  %s965_s29 = sshll.u32 %s1382_s15, 4 }
  0x78   : > { %v476_v53 = vadd.f32 %v475_v46, %v474_v48  ;;  %v545_v55 = vadd.f32 0.5, %v544_v50  ;;  %v406_v60 = vmul.f32 %v371_v51, %v371_v51  ;;  %v1678_v8 = vmul.f32 0.49999997, %v950_v2  ;;  %s2000_s10 = scalar_lea.hbm %s2050_s3, %s965_s29  ;;  %s779_s18 = scalar_lea.sflag [#allocation6], %s1586_s9 }
  0x79   : > { %v458_v57 = vmax.f32 %v457_v52, 0.001  ;;  %v978_v59 = vand.u32 2147483647, %v1665_v54  ;;  %v1680_v10 = vmax.f32 %v571_v4, 1e-06  ;;  %vm995_vm1 = vcmp.ne.f32.partialorder %v1665_v54, %v1665_v54 }
  0x7a   : > { %v477_v58 = vadd.f32 1e-06, %v476_v53  ;;  %v1669_v63 = vmax.f32 %v545_v55, 1e-06  ;;  %v1676_v3 = vmul.f32 %v406_v60, %v406_v60  ;;  %v578_v19 = vmul.f32 0.5, %v955_v5  ;;  %s1304_s21 = scalar_lea.vmem %s1995_s22, 16 }
  0x7b   : > { %v459_v62 = vmin.f32 %v458_v57, 1.0  ;;  %v1030_v18 = vand.u32 2147483647, %v1680_v10  ;;  %vm982_vm0 = vcmp.lt.f32.partialorder %v1665_v54, 0  ;;  %vm983_vm2 = vcmp.eq.f32.partialorder %v1665_v54, 0  ;;  %p1305_p3 = scmp.ne.s32.totalorder %s1995_s22, %s1304_s21  ;;  %p2073_p12 = scmp.ne.s32.totalorder %s2055_s25, 0 }
  0x7c   : > { %1202 = vrsqrt.f32 %v477_v58  ;;  %v1004_v1 = vand.u32 2147483647, %v1669_v63  ;;  %v935_v16 = vadd.f32 -1.0, %v1676_v3  ;;  %v416_v17 = vsub.f32 1.0, %v1676_v3  ;;  %s1397_s15 = smov [#allocation9]  }
  0x7d   : > { %1204 = vlog2.f32 %v978_v59  ;;  %v500_v6 = vmul.f32 %v459_v62, %v459_v62  ;;  %vm1741_vm3 = vcmp.eq.f32.partialorder %v978_v59, 2139095040  ;;  %vm984_vm4 = vcmp.eq.f32.partialorder %v1665_v54, 1065353216  ;;  %p1306_p13 = pnand %p1305_p3, %p2073_p12 }
  0x7e   : > { %1206 = vlog2.f32 %v1004_v1  ;;  %vm1008_vm5 = vcmp.lt.f32.partialorder %v1669_v63, 0  ;;  %vm1009_vm6 = vcmp.eq.f32.partialorder %v1669_v63, 0  ;;  %vm1757_vm7 = vcmp.eq.f32.partialorder %v1004_v1, 2139095040 }
  0x7f   : > { %v1690_v23 = vmul.f32 %v500_v6, %v500_v6  ;;  %1208 = vlog2.f32 %v1030_v18  ;;  %vm1034_vm8 = vcmp.lt.f32.partialorder %v1680_v10, 0  ;;  %vm1035_vm11 = vcmp.eq.f32.partialorder %v1680_v10, 0  ;;  %p1307_p7 = pneg %p1306_p13 }
  0x80   : > { %v1201_v7 = vpop.eup %1200  ;;  %vm1021_vm14 = vcmp.ne.f32.partialorder %v1669_v63, %v1669_v63  ;;  %vm1784_vm15 = vcmp.eq.f32.partialorder %v1030_v18, 2139095040 }
  0x81   : > { %v385_v11 = vmul.f32 %v1201_v7, %v1631_v9  ;;  %v386_v14 = vmul.f32 %v1201_v7, %v1634_v12  ;;  %v387_v15 = vmul.f32 %v1201_v7, %v1637_v13  ;;  %v510_v39 = vsub.f32 1.0, %v1690_v23 }
  0x83   : > { %v388_v20 = vmul.f32 0.051442165, %v385_v11  ;;  %v389_v21 = vmul.f32 0.28564808, %v386_v14  ;;  %v391_v22 = vmul.f32 0.9569529, %v387_v15 }
  0x84   : > { %v394_v9 = vmul.f32 0.28221625, %v385_v11  ;;  %v395_v24 = vmul.f32 0.18814418, %v386_v14  ;;  %v397_v12 = vmul.f32 0.94072086, %v387_v15 }
  0x85   : > { %v390_v25 = vadd.f32 %v389_v21, %v388_v20  ;;  %v400_v26 = vmul.f32 -0.18257418, %v385_v11  ;;  %v401_v27 = vmul.f32 0.36514837, %v386_v14  ;;  %v403_v28 = vmul.f32 0.91287094, %v387_v15 }
  0x86   : > { %v1203_v13 = vpop.eup %1202  ;;  %v396_v31 = vadd.f32 %v395_v24, %v394_v9  ;;  %v952_v11 = vclamps-f32 %v951_v56, 1.0  ;;  %v579_v21 = vadd.f32 0.5, %v578_v19  ;;  %v1722_v19 = vadd.f32 0.5, %v1678_v8 }
  0x87   : > { %v1205_v30 = vpop.eup %1204  ;;  %v479_v33 = vmul.f32 %v1203_v13, %v1649_v29  ;;  %v480_v34 = vmul.f32 %v1203_v13, %v1652_v32  ;;  %v481_v35 = vmul.f32 %v1203_v13, %v1656_v37  ;;  %v392_v36 = vadd.f32 %v391_v22, %v390_v25 }
  0x88   : > { %v402_v38 = vadd.f32 %v401_v27, %v400_v26  ;;  %v980_v40 = vmul.f32 2.2, %v1205_v30  ;;  %v398_v41 = vadd.f32 %v397_v12, %v396_v31  ;;  %v1207_v37 = vpop.eup %1206  ;;  %v556_v26 = vmul.f32 0.49999997, %v952_v11 }
  0x89   : > { %v482_v42 = vmul.f32 0.051442165, %v479_v33  ;;  %v483_v43 = vmul.f32 0.28564808, %v480_v34  ;;  %v485_v44 = vmul.f32 0.9569529, %v481_v35  ;;  %v1209_v4 = vpop.eup %1208 }
  0x8a   : > { %v393_v45 = vmax.f32 %v392_v36, 1e-06  ;;  %v404_v46 = vadd.f32 %v403_v28, %v402_v38  ;;  %v488_v47 = vmul.f32 0.28221625, %v479_v33  ;;  %v489_v48 = vmul.f32 0.18814418, %v480_v34 }
  0x8b   : > { %v1698_v49 = vmax.f32 %v398_v41, 1e-06  ;;  %v484_v29 = vadd.f32 %v483_v43, %v482_v42  ;;  %v491_v32 = vmul.f32 0.94072086, %v481_v35  ;;  %v494_v50 = vmul.f32 -0.18257418, %v479_v33 }
  0x8c   : > { %v1700_v51 = vmax.f32 %v404_v46, 1e-06  ;;  %v408_v52 = vmul.f32 %v393_v45, %v393_v45  ;;  %v490_v53 = vadd.f32 %v489_v48, %v488_v47  ;;  %v495_v55 = vmul.f32 0.36514837, %v480_v34  ;;  %v956_v34 = vld [vmem:[%s1590_s4 + $0x14] sm:$0x3] }
  0x8d   : > { %v417_v57 = vmul.f32 %v416_v17, %v1698_v49  ;;  %v486_v58 = vadd.f32 %v485_v44, %v484_v29  ;;  %v497_v60 = vmul.f32 0.91287094, %v481_v35  ;;  %1210 = vpow2.f32 %v980_v40  ;;  %v957_v38 = vld [vmem:[%s1597_s11 + $0x14] sm:$0x3]  ;;  %v655_v46 = vld [vmem:[#allocation2 + $0x2] sm:$0x3] }
  0x8e   : > { %v410_v61 = vmul.f32 %v935_v16, %v408_v52  ;;  %v427_v62 = vmul.f32 %v416_v17, %v1700_v51  ;;  %v492_v0 = vadd.f32 %v491_v32, %v490_v53  ;;  %v496_v2 = vadd.f32 %v495_v55, %v494_v50 }
  0x8f   : > { %v418_v5 = vmul.f32 %v417_v57, %v1698_v49  ;;  %v487_v6 = vmax.f32 %v486_v58, 1e-06  ;;  %v1006_v7 = vmul.f32 2.2, %v1207_v37  ;;  %v948_v17 = vadd.f32 -1.0, %v1690_v23 }
  0x90   : > { %v428_v14 = vmul.f32 %v427_v62, %v1700_v51  ;;  %v1707_v15 = vmax.f32 %v492_v0, 1e-06  ;;  %v498_v20 = vadd.f32 %v497_v60, %v496_v2  ;;  %v411_v22 = vadd.f32 1.0, %v410_v61  ;;  %v960_v2 = vld [vmem:[%s1597_s11 + $0x4] sm:$0x3] }
  0x91   : > { %v1710_v9 = vadd.f32 %v418_v5, %v1676_v3  ;;  %v502_v16 = vmul.f32 %v487_v6, %v487_v6  ;;  %1212 = vpow2.f32 %v1006_v7  ;;  %v1032_v25 = vmul.f32 2.2, %v1209_v4 }
  0x92   : > { %v1714_v24 = vadd.f32 %v428_v14, %v1676_v3  ;;  %v1716_v12 = vmax.f32 %v498_v20, 1e-06  ;;  %v511_v13 = vmul.f32 %v510_v39, %v1707_v15  ;;  %v412_v31 = vmul.f32 3.1415927, %v411_v22 }
  0x93   : > { %1214 = vrsqrt.f32 %v1710_v9  ;;  %v504_v27 = vmul.f32 %v948_v17, %v502_v16  ;;  %v1729_v33 = vmax.f32 %v579_v21, 1e-06  ;;  %v1745_v42 = vadd.f32 0.5, %v556_v26 }
  0x94   : > { %1216 = vrsqrt.f32 %v1714_v24  ;;  %v512_v28 = vmul.f32 %v511_v13, %v1707_v15  ;;  %v521_v30 = vmul.f32 %v510_v39, %v1716_v12  ;;  %v959_v39 = vld [vmem:[%s1590_s4 + $0x4] sm:$0x3]  ;;  %v413_v45 = vmul.f32 %v412_v31, %v411_v22 }
  0x95   : > { %1218 = vpow2.f32 %v1032_v25  ;;  %v1056_v43 = vand.u32 2147483647, %v1729_v33  ;;  %v505_v44 = vadd.f32 1.0, %v504_v27  ;;  %v584_v47 = vmul.f32 0.49999997, %v956_v34 }
  0x96   : > { %v1733_v8 = vadd.f32 %v512_v28, %v1690_v23  ;;  %v522_v36 = vmul.f32 %v521_v30, %v1716_v12  ;;  %v958_v29 = vclamps-f32 %v957_v38, 1.0  ;;  %v605_v32 = vmul.f32 0.5, %v959_v39  ;;  %v962_v39 = vld [vmem:[%s1590_s4 + $0x16] sm:$0x3]  ;;  %s1308_s4 = sshll.u32 %s1397_s15, 4  ;;  %s1309_s4 = int_to_ptr.vmem [resolvable:$false] %s1308_s4 }
  0x97   : > { %v1211_v35 = vpop.eup %1210  ;;  %vm422_vm9 = vcmp.eq.f32.partialorder %v1710_v9, inf  ;;  %vm424_vm10 = vcmp.eq.f32.partialorder %v1710_v9, 0.0  ;;  %v425_v37 = vand.u32 2147483648, %v1710_v9  ;;  %vm432_vm12 = vcmp.eq.f32.partialorder %v1714_v24, inf  ;;  %s1310_s28 = scalar_lea.vmem %s1309_s4, 32  ;;  %p1311_p10 = scmp.lt.s32.totalorder %s1995_s22, %s1309_s4 }
  0x98   : > { %v988_v41 = vsel %vm982_vm0, 2143289344, %v1211_v35  ;;  %1220 = vrsqrt.f32 %v1733_v8  ;;  %v1753_v59 = vadd.f32 %v522_v36, %v1690_v23  ;;  %vm434_vm13 = vcmp.eq.f32.partialorder %v1714_v24, 0.0  ;;  %p1312_p9 = scmp.lt.s32.totalorder %s1310_s28, %s1304_s21 }
  0x99   : > { %1222 = vlog2.f32 %v1056_v43  ;;  %v989_v48 = vsel %vm983_vm2, 0, %v988_v41  ;;  %v506_v52 = vmul.f32 3.1415927, %v505_v44  ;;  %v435_v56 = vand.u32 2147483648, %v1714_v24 }
  0x9a   : > { %1224 = vrsqrt.f32 %v1753_v59  ;;  %v994_v57 = vsel %vm1741_vm3, 2139095040, %v989_v48  ;;  %v1788_v62 = vadd.f32 0.5, %v584_v47  ;;  %v606_v0 = vadd.f32 0.5, %v605_v32  ;;  %v665_v32 = vld [vmem:[#allocation2 + $0x4] sm:$0x3]  ;;  %p1313_p11 = por %p1312_p9, %p1311_p10 }
  0x9b   : > { %v1213_v50 = vpop.eup %1212  ;;  %1226 = vrcp.f32 %v413_v45  ;;  %vm645_vm0 = vcmask 1041408   ;;  %vm516_vm2 = vcmp.eq.f32.partialorder %v1733_v8, inf  ;;  %vm518_vm3 = vcmp.eq.f32.partialorder %v1733_v8, 0.0  ;;  %v644_v45 = vld [vmem:[#allocation2] sm:$0x3] }
  0x9c   : > { %v1014_v60 = vsel %vm1008_vm5, 2143289344, %v1213_v50  ;;  %v590_v5 = vmul.f32 0.49999997, %v958_v29  ;;  %v507_v11 = vmul.f32 %v506_v52, %v505_v44  ;;  %v998_v14 = vsel %vm995_vm1, 2143289344, %v994_v57  ;;  %v963_v52 = vld [vmem:[%s1597_s11 + $0x16] sm:$0x3]  ;;  %p1314_p1 = pnand %p1313_p11, %p1307_p7 }
  0x9d   : > { %v1215_v1 = vpop.eup %1214  ;;  %vm1010_vm5 = vcmp.eq.f32.partialorder %v1669_v63, 1065353216  ;;  %v1015_v22 = vsel %vm1009_vm6, 0, %v1014_v60  ;;  %v519_v13 = vand.u32 2147483648, %v1733_v8  ;;  %vm1047_vm1 = vcmp.ne.f32.partialorder %v1680_v10, %v1680_v10  ;;  %v675_v60 = vld [vmem:[#allocation2 + $0x6] sm:$0x3] }
  0x9e   : > { %v1217_v53 = vpop.eup %1216  ;;  %v421_v55 = vmul.f32 %v1215_v1, %v1710_v9  ;;  %v1815_v25 = vmax.f32 %v606_v0, 1e-06  ;;  %v999_v27 = vsel %vm984_vm4, 1065353216, %v998_v14  ;;  %v1020_v30 = vsel %vm1757_vm7, 2139095040, %v1015_v22 }
  0x9f   : > { %v431_v58 = vmul.f32 %v1217_v53, %v1714_v24  ;;  %v1219_v6 = vpop.eup %1218  ;;  %1228 = vrcp.f32 %v507_v11  ;;  %v529_v38 = vand.u32 2147483648, %v1753_v59  ;;  %vm1036_vm4 = vcmp.eq.f32.partialorder %v1680_v10, 1065353216 }
  0xa0   : > { %v423_v4 = vsel %vm422_vm9, %v1710_v9, %v421_v55  ;;  %v961_v9 = vclamps-f32 %v960_v2, 1.0  ;;  %vm526_vm9 = vcmp.eq.f32.partialorder %v1753_v59, inf  ;;  %v1082_v34 = vand.u32 2147483647, %v1815_v25 }
  0xa1   : > { %v426_v18 = vsel %vm424_vm10, %v425_v37, %v423_v4  ;;  %v433_v7 = vsel %vm432_vm12, %v1714_v24, %v431_v58  ;;  %vm528_vm10 = vcmp.eq.f32.partialorder %v1753_v59, 0.0  ;;  %v1024_v48 = vsel %vm1021_vm14, 2143289344, %v1020_v30 }
  0xa2   : > { %v436_v20 = vsel %vm434_vm13, %v435_v56, %v433_v7  ;;  %v437_v21 = vadd.f32 %v426_v18, %v1698_v49  ;;  %v1221_v16 = vpop.eup %1220  ;;  %v613_v54 = vmul.f32 0.5, %v961_v9  ;;  %v1840_v29 = vmul.f32 0.31830987, %v999_v27 }
  0xa3   : > { %v438_v17 = vadd.f32 %v436_v20, %v1700_v51  ;;  %v1223_v24 = vpop.eup %1222  ;;  %v515_v26 = vmul.f32 %v1221_v16, %v1733_v8  ;;  %v1040_v51 = vsel %vm1034_vm8, 2143289344, %v1219_v6  ;;  %vm1060_vm6 = vcmp.lt.f32.partialorder %v1729_v33, 0 }
  0xa4   : > { %v1058_v31 = vmul.f32 2.2, %v1223_v24  ;;  %v1225_v35 = vpop.eup %1224  ;;  %v1041_v44 = vsel %vm1035_vm11, 0, %v1040_v51  ;;  %vm1061_vm7 = vcmp.eq.f32.partialorder %v1729_v33, 0  ;;  %v619_v37 = vmul.f32 0.49999997, %v962_v39 }
  0xa5   : > { %v439_v28 = vmul.f32 %v438_v17, %v437_v21  ;;  %v517_v36 = vsel %vm516_vm2, %v1733_v8, %v515_v26  ;;  %v525_v41 = vmul.f32 %v1225_v35, %v1753_v59  ;;  %v1227_v47 = vpop.eup %1226  ;;  %v1843_v8 = vadd.f32 0.5, %v590_v5  ;;  %v695_v17 = vld [vmem:[#allocation2 + $0xa] sm:$0x3] }
  0xa6   : > { %v520_v40 = vsel %vm518_vm3, %v519_v13, %v517_v36  ;;  %v1046_v55 = vsel %vm1784_vm15, 2139095040, %v1041_v44  ;;  %vm1860_vm8 = vcmp.eq.f32.partialorder %v1056_v43, 2139095040  ;;  %v614_v57 = vadd.f32 0.5, %v613_v54  ;;  %v685_v43 = vld [vmem:[#allocation2 + $0x8] sm:$0x3] }
  0xa7   : > { %1230 = vrcp.f32 %v439_v28  ;;  %v527_v50 = vsel %vm526_vm9, %v1753_v59, %v525_v41  ;;  %v531_v1 = vadd.f32 %v520_v40, %v1707_v15  ;;  %v646_v58 = vsel %vm645_vm0, %v644_v45, 0.0 }
  0xa8   : > { %1232 = vpow2.f32 %v1058_v31  ;;  %v530_v53 = vsel %vm528_vm10, %v529_v38, %v527_v50  ;;  %vm1073_vm11 = vcmp.ne.f32.partialorder %v1729_v33, %v1729_v33  ;;  %v647_v59 = vrot.slane %v646_v58, 4 }
  0xa9   : > { %1234 = vlog2.f32 %v1082_v34  ;;  %v532_v0 = vadd.f32 %v530_v53, %v1716_v12  ;;  %v656_v61 = vsel %vm645_vm0, %v655_v46, 0.0  ;;  %v666_v2 = vsel %vm645_vm0, %v665_v32, 0.0  ;;  %v1229_v13 = vpop.eup %1228 }
  0xaa   : > { %v1025_v4 = vsel %vm1010_vm5, 1065353216, %v1024_v48  ;;  %v1872_v5 = vmax.f32 %v614_v57, 1e-06  ;;  %v657_v6 = vrot.slane %v656_v61, 4  ;;  %v667_v18 = vrot.slane %v666_v2, 4 }
  0xab   : > { %v415_v7 = vmul.f32 %v1227_v47, %v1676_v3  ;;  %v533_v11 = vmul.f32 %v532_v0, %v531_v1  ;;  %vm1062_vm12 = vcmp.eq.f32.partialorder %v1729_v33, 1065353216  ;;  %v648_v12 = vadd.f32 %v647_v59, %v646_v58 }
  0xac   : > { %v676_v14 = vsel %vm645_vm0, %v675_v60, 0.0  ;;  %v1050_v63 = vsel %vm1047_vm1, 2143289344, %v1046_v55  ;;  %v1108_v20 = vand.u32 2147483647, %v1872_v5  ;;  %v964_v21 = vclamps-f32 %v963_v52, 1.0 }
  0xad   : > { %v686_v22 = vsel %vm645_vm0, %v685_v43, 0.0  ;;  %1236 = vrcp.f32 %v533_v11  ;;  %v1887_v3 = vmul.f32 0.31830987, %v1025_v4  ;;  %v649_v9 = vrot.slane %v648_v12, 2  ;;  %v705_v60 = vld [vmem:[#allocation2 + $0xc] sm:$0x3] }
  0xae   : > { %v658_v16 = vadd.f32 %v657_v6, %v656_v61  ;;  %1238 = vlog2.f32 %v1108_v20  ;;  %v620_v24 = vadd.f32 0.5, %v619_v37  ;;  %v668_v26 = vadd.f32 %v667_v18, %v666_v2 }
  0xaf   : > { %v677_v27 = vrot.slane %v676_v14, 4  ;;  %v1051_v28 = vsel %vm1036_vm4, 1065353216, %v1050_v63  ;;  %v650_v30 = vadd.f32 %v649_v9, %v648_v12  ;;  %v687_v35 = vrot.slane %v686_v22, 4 }
  0xb0   : > { %v659_v31 = vrot.slane %v658_v16, 2  ;;  %v625_v54 = vmul.f32 0.49999997, %v964_v21  ;;  %v669_v39 = vrot.slane %v668_v26, 2  ;;  %v696_v40 = vsel %vm645_vm0, %v695_v17, 0.0 }
  0xb1   : > { %v1231_v51 = vpop.eup %1230  ;;  %v651_v45 = vrot.slane %v650_v30, 1  ;;  %v678_v47 = vadd.f32 %v677_v27, %v676_v14  ;;  %v592_v48 = vmul.f32 0.31830987, %v1051_v28  ;;  %v688_v50 = vadd.f32 %v687_v35, %v686_v22  ;;  %v735_v28 = vld [vmem:[#allocation2 + $0x12] sm:$0x3] }
  0xb2   : > { %v1233_v36 = vpop.eup %1232  ;;  %v441_v38 = vmul.f32 %v1231_v51, %v415_v7  ;;  %v660_v46 = vadd.f32 %v659_v31, %v658_v16  ;;  %v697_v53 = vrot.slane %v696_v40, 4  ;;  %v509_v55 = vmul.f32 %v1229_v13, %v1690_v23  ;;  %v715_v23 = vld [vmem:[#allocation2 + $0xe] sm:$0x3]  ;;  %v725_v51 = vld [vmem:[#allocation2 + $0x10] sm:$0x3] }
  0xb3   : > { %v1235_v41 = vpop.eup %1234  ;;  %v1066_v44 = vsel %vm1060_vm6, 2143289344, %v1233_v36  ;;  %v652_v37 = vadd.f32 %v651_v45, %v650_v30  ;;  %vm1086_vm13 = vcmp.lt.f32.partialorder %v1815_v25, 0  ;;  %v1911_v58 = vadd.f32 0.5, %v625_v54 }
  0xb4   : > { %v1067_v10 = vsel %vm1061_vm7, 0, %v1066_v44  ;;  %v1084_v32 = vmul.f32 2.2, %v1235_v41  ;;  %v661_v52 = vrot.slane %v660_v46, 1  ;;  %v559_v0 = vmul.f32 %v1722_v19, %v441_v38 }
  0xb5   : > { %v1072_v1 = vsel %vm1860_vm8, 2139095040, %v1067_v10  ;;  %vm1087_vm14 = vcmp.eq.f32.partialorder %v1815_v25, 0  ;;  %653 = vst [vmem:[%s1902_s8] sm:$0x1] %v652_v37  ;;  %v670_v59 = vadd.f32 %v669_v39, %v668_v26  ;;  %v679_v61 = vrot.slane %v678_v47, 2 }
  0xb6   : > { %v1076_v57 = vsel %vm1073_vm11, 2143289344, %v1072_v1  ;;  %1240 = vpow2.f32 %v1084_v32  ;;  %v662_v56 = vadd.f32 %v661_v52, %v660_v46  ;;  %v593_v43 = vmul.f32 %v1788_v62, %v441_v38 }
  0xb7   : > { %v1077_v2 = vsel %vm1062_vm12, 1065353216, %v1076_v57  ;;  %vm1921_vm15 = vcmp.eq.f32.partialorder %v1082_v34, 2139095040  ;;  %v1925_v6 = vmul.f32 %v620_v24, %v441_v38  ;;  %v689_v19 = vrot.slane %v688_v50, 2  ;;  %v1237_v18 = vpop.eup %1236 }
  0xb8   : > { %vm1099_vm2 = vcmp.ne.f32.partialorder %v1815_v25, %v1815_v25  ;;  %663 = vst [vmem:[%s1902_s8 + $0x1] sm:$0x1] %v662_v56  ;;  %v671_v7 = vrot.slane %v670_v59, 1  ;;  %v680_v11 = vadd.f32 %v679_v61, %v678_v47  ;;  %v698_v33 = vadd.f32 %v697_v53, %v696_v40  ;;  %v1239_v62 = vpop.eup %1238 }
  0xb9   : > { %v706_v12 = vsel %vm645_vm0, %v705_v60, 0.0  ;;  %v535_v14 = vmul.f32 %v1237_v18, %v509_v55  ;;  %vm1088_vm3 = vcmp.eq.f32.partialorder %v1815_v25, 1065353216  ;;  %v690_v34 = vadd.f32 %v689_v19, %v688_v50 }
  0xba   : > { %v707_v63 = vrot.slane %v706_v12, 4  ;;  %v716_v21 = vsel %vm645_vm0, %v715_v23, 0.0  ;;  %v1110_v22 = vmul.f32 2.2, %v1239_v62  ;;  %v672_v9 = vadd.f32 %v671_v7, %v670_v59 }
  0xbb   : > { %v681_v16 = vrot.slane %v680_v11, 1  ;;  %v699_v17 = vrot.slane %v698_v33, 2  ;;  %v560_v13 = vadd.f32 %v559_v0, %v1840_v29  ;;  %v563_v24 = vmul.f32 %v1745_v42, %v535_v14  ;;  %v745_v0 = vld [vmem:[#allocation2 + $0x14] sm:$0x3] }
  0xbc   : > { %v594_v26 = vadd.f32 %v593_v43, %v592_v48  ;;  %v691_v27 = vrot.slane %v690_v34, 1  ;;  %1242 = vpow2.f32 %v1110_v22  ;;  %vm1112_vm5 = vcmp.lt.f32.partialorder %v1872_v5, 0  ;;  %673 = vst [vmem:[%s1902_s8 + $0x2] sm:$0x1] %v672_v9 }
  0xbd   : > { %v682_v30 = vadd.f32 %v681_v16, %v680_v11  ;;  %v700_v31 = vadd.f32 %v699_v17, %v698_v33  ;;  %v708_v35 = vadd.f32 %v707_v63, %v706_v12  ;;  %v596_v36 = vmul.f32 0.31830987, %v1077_v2  ;;  %v755_v2 = vld [vmem:[#allocation2 + $0x16] sm:$0x3] }
  0xbe   : > { %v597_v38 = vmul.f32 %v1843_v8, %v535_v14  ;;  %vm1113_vm9 = vcmp.eq.f32.partialorder %v1872_v5, 0  ;;  %v692_v29 = vadd.f32 %v691_v27, %v690_v34  ;;  %v717_v42 = vrot.slane %v716_v21, 4 }
  0xbf   : > { %vm1941_vm1 = vcmp.eq.f32.partialorder %v1108_v20, 2139095040  ;;  %683 = vst [vmem:[%s1902_s8 + $0x3] sm:$0x1] %v682_v30  ;;  %v701_v39 = vrot.slane %v700_v31, 1  ;;  %v709_v40 = vrot.slane %v708_v35, 2  ;;  %v726_v41 = vsel %vm645_vm0, %v725_v51, 0.0 }
  0xc0   : > { %v736_v44 = vsel %vm645_vm0, %v735_v28, 0.0  ;;  %v1241_v45 = vpop.eup %1240  ;;  %v561_v8 = vmul.f32 %v560_v13, %v1698_v49  ;;  %v564_v46 = vadd.f32 %v563_v24, %v1887_v3  ;;  %vm1125_vm10 = vcmp.ne.f32.partialorder %v1872_v5, %v1872_v5  ;;  %693 = vst [vmem:[%s1902_s8 + $0x4] sm:$0x1] %v692_v29 }
  0xc1   : > { %v718_v20 = vadd.f32 %v717_v42, %v716_v21  ;;  %v727_v47 = vrot.slane %v726_v41, 4  ;;  %v1092_v10 = vsel %vm1086_vm13, 2143289344, %v1241_v45  ;;  %vm1114_vm4 = vcmp.eq.f32.partialorder %v1872_v5, 1065353216 }
  0xc2   : > { %v702_v48 = vadd.f32 %v701_v39, %v700_v31  ;;  %v710_v32 = vadd.f32 %v709_v40, %v708_v35  ;;  %v737_v50 = vrot.slane %v736_v44, 4  ;;  %v595_v1 = vmul.f32 %v594_v26, %v1698_v49 }
  0xc3   : > { %v598_v37 = vadd.f32 %v597_v38, %v596_v36  ;;  %v1093_v3 = vsel %vm1087_vm14, 0, %v1092_v10  ;;  %v719_v52 = vrot.slane %v718_v20, 2  ;;  %v728_v57 = vadd.f32 %v727_v47, %v726_v41 }
  0xc4   : > { %v1098_v53 = vsel %vm1921_vm15, 2139095040, %v1093_v3  ;;  %703 = vst [vmem:[%s1902_s8 + $0x5] sm:$0x1] %v702_v48  ;;  %v711_v55 = vrot.slane %v710_v32, 1  ;;  %v738_v60 = vadd.f32 %v737_v50, %v736_v44  ;;  %v565_v56 = vmul.f32 %v564_v46, %v1707_v15 }
  0xc5   : > { %v1102_v59 = vsel %vm1099_vm2, 2143289344, %v1098_v53  ;;  %v632_v61 = vmul.f32 %v1911_v58, %v535_v14  ;;  %v720_v23 = vadd.f32 %v719_v52, %v718_v20  ;;  %v729_v19 = vrot.slane %v728_v57, 2 }
  0xc6   : > { %v1103_v43 = vsel %vm1088_vm3, 1065353216, %v1102_v59  ;;  %v712_v4 = vadd.f32 %v711_v55, %v710_v32  ;;  %v739_v18 = vrot.slane %v738_v60, 2  ;;  %v599_v7 = vmul.f32 %v598_v37, %v1707_v15  ;;  %v1243_v62 = vpop.eup %1242  ;;  %v638_v32 = vld [vmem:[#allocation3] sm:$0x3] }
  0xc7   : > { %v627_v11 = vmul.f32 0.31830987, %v1103_v43  ;;  %v721_v33 = vrot.slane %v720_v23, 1  ;;  %v746_v12 = vsel %vm645_vm0, %v745_v0, 0.0  ;;  %v730_v34 = vadd.f32 %v729_v19, %v728_v57 }
  0xc8   : > { %713 = vst [vmem:[%s1902_s8 + $0x6] sm:$0x1] %v712_v4  ;;  %v740_v63 = vadd.f32 %v739_v18, %v738_v60  ;;  %v747_v58 = vrot.slane %v746_v12, 4  ;;  %v756_v14 = vsel %vm645_vm0, %v755_v2, 0.0  ;;  %v566_v21 = vsub.f32 %v561_v8, %v565_v56 }
  0xc9   : > { %v1118_v25 = vsel %vm1112_vm5, 2143289344, %v1243_v62  ;;  %v722_v22 = vadd.f32 %v721_v33, %v720_v23  ;;  %v757_v9 = vrot.slane %v756_v14, 4  ;;  %v731_v17 = vrot.slane %v730_v34, 1 }
  0xca   : > { %v1119_v16 = vsel %vm1113_vm9, 0, %v1118_v25  ;;  %v741_v13 = vrot.slane %v740_v63, 1  ;;  %v748_v24 = vadd.f32 %v747_v58, %v746_v12  ;;  %v600_v26 = vsub.f32 %v595_v1, %v599_v7 }
  0xcb   : > { %v1124_v27 = vsel %vm1941_vm1, 2139095040, %v1119_v16  ;;  %v629_v51 = vadd.f32 %v1925_v6, %v627_v11  ;;  %723 = vst [vmem:[%s1902_s8 + $0x7] sm:$0x1] %v722_v22  ;;  %v758_v28 = vadd.f32 %v757_v9, %v756_v14  ;;  %v732_v31 = vadd.f32 %v731_v17, %v730_v34 }
  0xcc   : > { %v1128_v30 = vsel %vm1125_vm10, 2143289344, %v1124_v27  ;;  %v742_v35 = vadd.f32 %v741_v13, %v740_v63  ;;  %v749_v36 = vrot.slane %v748_v24, 2  ;;  %v567_v6 = vmul.f32 %v566_v21, %v566_v21 }
  0xcd   : > { %v1129_v38 = vsel %vm1114_vm4, 1065353216, %v1128_v30  ;;  %v759_v29 = vrot.slane %v758_v28, 2  ;;  %733 = vst [vmem:[%s1902_s8 + $0x8] sm:$0x1] %v732_v31  ;;  %v601_v40 = vmul.f32 %v600_v26, %v600_v26  ;;  %v630_v41 = vmul.f32 %v629_v51, %v1698_v49 }
  0xce   : > { %v631_v42 = vmul.f32 0.31830987, %v1129_v38  ;;  %743 = vst [vmem:[%s1902_s8 + $0x9] sm:$0x1] %v742_v35  ;;  %v750_v54 = vadd.f32 %v749_v36, %v748_v24 }
  0xcf   : > { %v760_v39 = vadd.f32 %v759_v29, %v758_v28  ;;  %v602_v47 = vadd.f32 %v601_v40, %v567_v6 }
  0xd0   : > { %v633_v44 = vadd.f32 %v632_v61, %v631_v42  ;;  %v751_v45 = vrot.slane %v750_v54, 1 }
  0xd1   : > { %v761_v8 = vrot.slane %v760_v39, 1 }
  0xd2   : > { %v634_v46 = vmul.f32 %v633_v44, %v1707_v15  ;;  %v752_v20 = vadd.f32 %v751_v45, %v750_v54 }
  0xd3   : > { %v762_v5 = vadd.f32 %v761_v8, %v760_v39 }
  0xd4   : > { %v635_v10 = vsub.f32 %v630_v41, %v634_v46  ;;  %753 = vst [vmem:[%s1902_s8 + $0xa] sm:$0x1] %v752_v20 }
  0xd5   : > { %763 = vst [vmem:[%s1902_s8 + $0xb] sm:$0x1] %v762_v5 }
  0xd6   : > { %v636_v48 = vmul.f32 %v635_v10, %v635_v10 }
  0xd8   : > { %v637_v50 = vadd.f32 %v636_v48, %v602_v47 }
  0xda   : > { %v639_v1 = vadd.f32 %v638_v32, %v637_v50 }
  0xdc   : > { %640 = vst [vmem:[#allocation3] sm:$0x3] %v639_v1 }
  0xe3   : > { %v764_v49 = vld [vmem:[#allocation3] sm:$0x3] }
  0xe4   : > { %v765_v37 = vsel %vm645_vm0, %v764_v49, 0.0 }
  0xe5   : > { %v766_v3 = vrot.slane %v765_v37, 4 }
  0xe7   : > { %v767_v15 = vadd.f32 %v766_v3, %v765_v37 }
  0xe9   : > { %v768_v52 = vrot.slane %v767_v15, 2 }
  0xeb   : > { %v769_v53 = vadd.f32 %v768_v52, %v767_v15 }
  0xed   : > { %v770_v55 = vrot.slane %v769_v53, 1 }
  0xef   : > { %v771_v57 = vadd.f32 %v770_v55, %v769_v53 }
  0xf1   : > { %772 = vst [vmem:[%s253_s7] sm:$0x1] %v771_v57 }
  0xf2   : > { %1317 = shalt.err (!%p1314_p1)
}
  0xf3   : > { %s1318_s9 = scalar_lea.hbm %s2000_s10, 16  ;;  %s1322_s19 = scalar_lea.hbm %s2050_s3, 32 }
  0xf4   : > { %p1319_p5 = scmp.ne.s32.totalorder %s2000_s10, %s1318_s9  ;;  %p1323_p6 = scmp.lt.u32.totalorder %s2000_s10, %s2050_s3 }
  0xf5   : > { %p1324_p8 = scmp.lt.u32.totalorder %s1322_s19, %s1318_s9  ;;  %p1326_p3 = scmp.lt.u32.totalorder %s1318_s9, %s2000_s10 }
  0xf6   : > { %p1320_p2 = pnand %p1319_p5, %p2073_p12 }
  0xf7   : > { %p1325_p0 = por %p1324_p8, %p1323_p6 }
  0xf8   : > { %p1321_p4 = pneg %p1320_p2 }
  0xf9   : > { %p1327_p13 = por %p1326_p3, %p1325_p0 }
  0xfb   : > { %p1328_p7 = pnand %p1327_p13, %p1321_p4 }
  0xfd   : > { %1331 = shalt.err (!%p1328_p7)
}
  0xfe   : > { %1134 = dma.vmem_to_hbm [thread:$0]  (%p2073_p12), %s1995_s22, 16, %s2000_s10, %s779_s18  }
  0xff PF: > { %s814_s8 = sand.u32 1, %s1370_s12   ;;  %p2074_p10 = scmp.ne.s32.totalorder %s2056_s27, 0 }
 0x100   : > { %p2075_p9 = scmp.ge.s32.totalorder %s1390_s17, 2  ;;  %s815_s7 = scalar_lea.sflag [#allocation6], %s814_s8 }
 0x102   : > { %p1144_p11 = pnand %p2075_p9, %p2074_p10 }
 0x104   : > { %1365 = dma.done.wait (!%p1144_p11), %s815_s7, 16  }
 0x105   : > { %1367 = vsyncadd (!%p1144_p11), %s815_s7, 4294967280  ;;  %s23_s17 = sadd.s32 1, %s1390_s17   ;;  %s2076_s12 = smov %s1374_s13 }
 0x106   : > { %p20_p1 = scmp.ge.s32.totalorder %s23_s17, 4   ;;  %s2077_s13 = smov %s1378_s14 }
 0x107   : > { %s2078_s14 = smov %s1474_s26  ;;  %s2079_s15 = smov %s1386_s16 }
 0x108   : > { %s2080_s16 = smov %s2082_s20  ;;  %22 = sbr.rel (!%p20_p1) target bundleno = 8 (0x8), region = 139 }
 0x10f   :  { %819 = vsyncpa [#allocation5], 1 }
 0x110   :  { %821 = vsyncpa [#allocation5 + $0x1], 1 }
 0x111   :  { %822 = vsyncpa [#allocation8], 1 }
 0x112   :  { %824 = vsyncpa [#allocation8 + $0x1], 1 }
 0x113   :  { %825 = vsyncpa [#allocation6], 1 }
 0x114   :  { %827 = vsyncpa [#allocation6 + $0x1], 1 }

</bundles_post_ra>
